<compile_context>
chip_gen: v7x
topology: tpu7x:2x2x1
jax: 0.10.0
libtpu: 0.0.40
codegen_flags: <defaults>
</compile_context>

<pallas_src>
import jax
import jax.numpy as jnp
from jax.experimental import pallas as pl
from jax.experimental.pallas import tpu as pltpu

KH = KW = 3
CONV_OUT = 16
POOL = 3
H_IN = W_IN = 32
H_CONV = W_CONV = H_IN - KH + 1          # 30
H_POOL = W_POOL = H_CONV // POOL         # 10
NPOOL = H_POOL * W_POOL                  # 100 real pooled positions
NOFF = POOL * POOL                       # 9 pool-window offsets
NPOS_PAD = 128                           # pooled positions padded onto a full lane tile
HIGHEST = jax.lax.Precision.HIGHEST      # reference only


def fused_cnn_kernel(patches_ref, wc_ref, bc_ref, wl_ref, bl_ref, out_ref, acts_ref):
    # patches_ref: [BB, 9, KPAD, 128]   bf16  im2col patches, pooled positions on the lane axis
    # wc_ref:      [16, KPAD]           bf16  conv weight (k matches the patch feature order)
    # bc_ref:      [16, 1]              f32   conv bias (per channel -> sublane)
    # wl_ref:      [16, 128, NCLS_PAD]  f32   linear weight, per conv channel, classes padded
    # bl_ref:      [1, NCLS_PAD]        f32   linear bias
    # out_ref:     [1, BB, NCLS_PAD]    f32   logits (lane-dense store)
    # acts_ref:    [BB, 16, 128]        f32   VMEM scratch: pooled / ReLU'd activations
    bb, _, kpad, _ = patches_ref.shape

    # Conv weight broadcast once for the batched MXU matmul (hoisted out of the offset loop).
    w_b = jnp.broadcast_to(wc_ref[...], (bb, CONV_OUT, kpad))

    # Conv as one batched matmul per pool-window offset; 3x3 max-pool as a RUNNING max over
    # the 9 offsets (live temp is a single [BB, 16, 128] f32 tile, fully lane-dense).
    pooled = None
    for o in range(NOFF):
        conv_o = jnp.einsum(
            "bck,bkp->bcp", w_b, patches_ref[:, o, :, :],
            preferred_element_type=jnp.float32)               # [BB, 16, 128] f32
        pooled = conv_o if pooled is None else jnp.maximum(pooled, conv_o)

    # Bias (hoisted out of the max), ReLU, then explicitly zero the padded pooled positions
    # (lanes 100..127) so downstream math never sees max(bias, 0) from padding.
    acts = jnp.maximum(pooled + bc_ref[...][None], 0.0)        # [BB, 16, 128]
    pos = jax.lax.broadcasted_iota(jnp.int32, acts.shape, 2)
    acts = jnp.where(pos < NPOOL, acts, 0.0)
    acts_ref[...] = acts

    # Fused Linear on the MXU: per conv-channel [BB,128] x [128,NCLS_PAD] dots, f32 accumulate.
    acc = bl_ref[...]                                          # [1, NCLS_PAD], broadcasts up
    for c in range(CONV_OUT):
        acc = acc + jnp.dot(acts_ref[:, c, :], wl_ref[c],
                            preferred_element_type=jnp.float32)
    out_ref[0] = acc


def _pick_bb(batch):
    # Large batches: big blocks amortize per-step overhead and fill MXU M.
    # Small batches: split so the grid has >= 2 "parallel" steps (v7x second TensorCore).
    if batch >= 64:
        return 32
    if batch >= 16:
        return 8
    return max(1, batch // 2)


def model_forward(x_nchw, w_conv, b_conv, w_lin, b_lin):
    B, C, H, W = x_nchw.shape
    assert (H, W) == (H_IN, W_IN), "Linear(16*10*10) implies 32x32 input"
    K = KH * KW * C
    KPAD = 16 * pl.cdiv(K, 16)
    num_classes = w_lin.shape[0]
    NCLS_PAD = 128 * pl.cdiv(num_classes, 128)

    BB = _pick_bb(B)
    G = pl.cdiv(B, BB)
    B_pad = G * BB

    # ---------- glue: layout + im2col (pure indexing / reshapes, runs as XLA ops) ----------
    x = jnp.transpose(x_nchw, (0, 2, 3, 1)).astype(jnp.bfloat16)          # NHWC, bf16 operands
    cols = [x[:, kh:kh + H_CONV, kw:kw + W_CONV, :]
            for kh in range(KH) for kw in range(KW)]
    p = jnp.stack(cols, axis=3).reshape(B, H_CONV, W_CONV, K)             # k = (kh*3+kw)*C + c
    p = p.reshape(B, H_POOL, POOL, W_POOL, POOL, K)                       # (b, pi, qi, pj, qj, k)
    p = jnp.transpose(p, (0, 2, 4, 5, 1, 3)).reshape(B, NOFF, K, NPOOL)   # o=3qi+qj, pos=10pi+pj
    p = jnp.pad(p, ((0, B_pad - B), (0, 0), (0, KPAD - K), (0, NPOS_PAD - NPOOL)))

    # conv weight [16, C, 3, 3] -> [16, KPAD] matching the patch feature order
    wc = jnp.transpose(w_conv, (0, 2, 3, 1)).reshape(CONV_OUT, K)
    wc = jnp.pad(wc, ((0, 0), (0, KPAD - K))).astype(jnp.bfloat16)
    bc = b_conv.reshape(CONV_OUT, 1).astype(jnp.float32)

    # linear weight [ncls, 16*10*10] (PyTorch CHW flatten) -> [16, 128(pos), NCLS_PAD]
    wl = w_lin.reshape(num_classes, CONV_OUT, NPOOL).transpose(1, 2, 0)   # [16, 100, ncls]
    wl = jnp.pad(wl, ((0, 0), (0, NPOS_PAD - NPOOL), (0, NCLS_PAD - num_classes)))
    wl = wl.astype(jnp.float32)
    bl = jnp.pad(b_lin.reshape(1, num_classes),
                 ((0, 0), (0, NCLS_PAD - num_classes))).astype(jnp.float32)

    # ---------- single fused pallas_call: conv matmul + max-pool + ReLU + MXU linear ----------
    out = pl.pallas_call(
        fused_cnn_kernel,
        out_shape=jax.ShapeDtypeStruct((G, BB, NCLS_PAD), jnp.float32),
        grid_spec=pltpu.PrefetchScalarGridSpec(
            num_scalar_prefetch=0,
            grid=(G,),
            in_specs=[
                pl.BlockSpec((BB, NOFF, KPAD, NPOS_PAD), lambda i: (i, 0, 0, 0)),
                pl.BlockSpec((CONV_OUT, KPAD), lambda i: (0, 0)),
                pl.BlockSpec((CONV_OUT, 1), lambda i: (0, 0)),
                pl.BlockSpec((CONV_OUT, NPOS_PAD, NCLS_PAD), lambda i: (0, 0, 0)),
                pl.BlockSpec((1, NCLS_PAD), lambda i: (0, 0)),
            ],
            out_specs=pl.BlockSpec((1, BB, NCLS_PAD), lambda i: (i, 0, 0)),
            scratch_shapes=[pltpu.VMEM((BB, CONV_OUT, NPOS_PAD), jnp.float32)],
        ),
        compiler_params=pltpu.CompilerParams(
            dimension_semantics=("parallel",),          # batch blocks shard across TCs (v7x)
            vmem_limit_bytes=24 * 1024 * 1024,          # ~8.5 MiB actual at BB=32, fits v7x 64 MiB
        ),
    )(p, wc, bc, wl, bl)

    return out.reshape(B_pad, NCLS_PAD)[:B, :num_classes]


def reference(x_nchw, w_conv, b_conv, w_lin, b_lin):
    # Pure-JAX reference matching the PyTorch forward exactly (f32, HIGHEST precision).
    y = jax.lax.conv_general_dilated(
        x_nchw, w_conv, window_strides=(1, 1), padding="VALID",
        dimension_numbers=("NCHW", "OIHW", "NCHW"), precision=HIGHEST)
    y = y + b_conv[None, :, None, None]                                   # [B,16,30,30]
    B = y.shape[0]
    y = y.reshape(B, CONV_OUT, H_POOL, POOL, W_POOL, POOL).max(axis=(3, 5))
    y = jnp.maximum(y, 0.0).reshape(B, CONV_OUT * NPOOL)                  # PyTorch CHW flatten
    return jnp.dot(y, w_lin.T, precision=HIGHEST) + b_lin


if __name__ == "__main__":
    B, C, num_classes = 2, 3, 10
    key = jax.random.PRNGKey(0)
    k1, k2, k3, k4, k5 = jax.random.split(key, 5)

    x = jax.random.normal(k1, (B, C, H_IN, W_IN), dtype=jnp.float32)

    # Deterministic parameter init (shapes from the module's __init__).
    fan_conv = C * KH * KW
    w_conv = jax.random.uniform(k2, (CONV_OUT, C, KH, KW), jnp.float32, -1.0, 1.0) / jnp.sqrt(fan_conv)
    b_conv = jax.random.uniform(k3, (CONV_OUT,), jnp.float32, -1.0, 1.0) / jnp.sqrt(fan_conv)
    fan_lin = CONV_OUT * H_POOL * W_POOL
    w_lin = jax.random.uniform(k4, (num_classes, fan_lin), jnp.float32, -1.0, 1.0) / jnp.sqrt(fan_lin)
    b_lin = jax.random.uniform(k5, (num_classes,), jnp.float32, -1.0, 1.0) / jnp.sqrt(fan_lin)

    out = jax.block_until_ready(model_forward(x, w_conv, b_conv, w_lin, b_lin))
    ref = reference(x, w_conv, b_conv, w_lin, b_lin)

    assert out.shape == (B, num_classes)
    assert jnp.allclose(out, ref, rtol=1e-2, atol=1e-2), (out, ref)
    print("KERNEL_OK")
</pallas_src>

<mosaic_0001>
module attributes {stable_mosaic.version = 11 : i64} {
  func.func @fused_cnn_kernel(%arg0: i32, %arg1: memref<1x9x32x128xbf16, #tpu.memory_space<vmem>>, %arg2: memref<16x32xbf16, #tpu.memory_space<vmem>>, %arg3: memref<16x1xf32, #tpu.memory_space<vmem>>, %arg4: memref<16x128x128xf32, #tpu.memory_space<vmem>>, %arg5: memref<1x128xf32, #tpu.memory_space<vmem>>, %arg6: memref<1x1x128xf32, #tpu.memory_space<vmem>>, %arg7: memref<1x16x128xf32, #tpu.memory_space<vmem>>) attributes {dimension_semantics = [#tpu.dimension_semantics<parallel>], iteration_bounds = array<i64: 2>, scalar_prefetch = 0 : i64, scratch_operands = 1 : i64, tpu.core_type = #tpu.core_type<tc>, window_params = [{transform_indices = @transform_0, window_bounds = array<i64: 1, 9, 32, 128>}, {pipeline_mode = #tpu.pipeline_mode<synchronous>, transform_indices = @transform_1, window_bounds = array<i64: 16, 32>}, {pipeline_mode = #tpu.pipeline_mode<synchronous>, transform_indices = @transform_2, window_bounds = array<i64: 16, 1>}, {pipeline_mode = #tpu.pipeline_mode<synchronous>, transform_indices = @transform_3, window_bounds = array<i64: 16, 128, 128>}, {pipeline_mode = #tpu.pipeline_mode<synchronous>, transform_indices = @transform_4, window_bounds = array<i64: 1, 128>}, {transform_indices = @transform_5, window_bounds = array<i64: 1, 1, 128>}]} {
    %c0 = arith.constant 0 : index
    %c0_0 = arith.constant 0 : index
    %0 = vector.load %arg2[%c0, %c0_0] : memref<16x32xbf16, #tpu.memory_space<vmem>>, vector<16x32xbf16>
    %1 = vector.shape_cast %0 : vector<16x32xbf16> to vector<1x16x32xbf16>
    %c0_1 = arith.constant 0 : index
    %c0_2 = arith.constant 0 : index
    %c0_3 = arith.constant 0 : index
    %c0_4 = arith.constant 0 : index
    %2 = vector.load %arg1[%c0_1, %c0_2, %c0_3, %c0_4] : memref<1x9x32x128xbf16, #tpu.memory_space<vmem>>, vector<1x1x32x128xbf16>
    %3 = vector.shape_cast %2 : vector<1x1x32x128xbf16> to vector<1x32x128xbf16>
    "tpu.trace_start"() <{level = 10 : i32, message = "bck,bkp->bcp"}> : () -> ()
    %cst = arith.constant dense<0.000000e+00> : vector<1x16x128xf32>
    %4 = tpu.matmul %1, %3, %cst {dimension_numbers = #tpu.dot_dimension_numbers<[2], [1], [1], [2], [0, 0, 0, 1, 1, 2], [0], [0]>} : vector<1x16x32xbf16>, vector<1x32x128xbf16>, vector<1x16x128xf32> -> vector<1x16x128xf32>
    "tpu.trace_stop"() : () -> ()
    %c0_5 = arith.constant 0 : index
    %c1 = arith.constant 1 : index
    %c0_6 = arith.constant 0 : index
    %c0_7 = arith.constant 0 : index
    %5 = vector.load %arg1[%c0_5, %c1, %c0_6, %c0_7] : memref<1x9x32x128xbf16, #tpu.memory_space<vmem>>, vector<1x1x32x128xbf16>
    %6 = vector.shape_cast %5 : vector<1x1x32x128xbf16> to vector<1x32x128xbf16>
    "tpu.trace_start"() <{level = 10 : i32, message = "bck,bkp->bcp"}> : () -> ()
    %cst_8 = arith.constant dense<0.000000e+00> : vector<1x16x128xf32>
    %7 = tpu.matmul %1, %6, %cst_8 {dimension_numbers = #tpu.dot_dimension_numbers<[2], [1], [1], [2], [0, 0, 0, 1, 1, 2], [0], [0]>} : vector<1x16x32xbf16>, vector<1x32x128xbf16>, vector<1x16x128xf32> -> vector<1x16x128xf32>
    "tpu.trace_stop"() : () -> ()
    %8 = arith.maximumf %4, %7 : vector<1x16x128xf32>
    %c0_9 = arith.constant 0 : index
    %c2 = arith.constant 2 : index
    %c0_10 = arith.constant 0 : index
    %c0_11 = arith.constant 0 : index
    %9 = vector.load %arg1[%c0_9, %c2, %c0_10, %c0_11] : memref<1x9x32x128xbf16, #tpu.memory_space<vmem>>, vector<1x1x32x128xbf16>
    %10 = vector.shape_cast %9 : vector<1x1x32x128xbf16> to vector<1x32x128xbf16>
    "tpu.trace_start"() <{level = 10 : i32, message = "bck,bkp->bcp"}> : () -> ()
    %cst_12 = arith.constant dense<0.000000e+00> : vector<1x16x128xf32>
    %11 = tpu.matmul %1, %10, %cst_12 {dimension_numbers = #tpu.dot_dimension_numbers<[2], [1], [1], [2], [0, 0, 0, 1, 1, 2], [0], [0]>} : vector<1x16x32xbf16>, vector<1x32x128xbf16>, vector<1x16x128xf32> -> vector<1x16x128xf32>
    "tpu.trace_stop"() : () -> ()
    %12 = arith.maximumf %8, %11 : vector<1x16x128xf32>
    %c0_13 = arith.constant 0 : index
    %c3 = arith.constant 3 : index
    %c0_14 = arith.constant 0 : index
    %c0_15 = arith.constant 0 : index
    %13 = vector.load %arg1[%c0_13, %c3, %c0_14, %c0_15] : memref<1x9x32x128xbf16, #tpu.memory_space<vmem>>, vector<1x1x32x128xbf16>
    %14 = vector.shape_cast %13 : vector<1x1x32x128xbf16> to vector<1x32x128xbf16>
    "tpu.trace_start"() <{level = 10 : i32, message = "bck,bkp->bcp"}> : () -> ()
    %cst_16 = arith.constant dense<0.000000e+00> : vector<1x16x128xf32>
    %15 = tpu.matmul %1, %14, %cst_16 {dimension_numbers = #tpu.dot_dimension_numbers<[2], [1], [1], [2], [0, 0, 0, 1, 1, 2], [0], [0]>} : vector<1x16x32xbf16>, vector<1x32x128xbf16>, vector<1x16x128xf32> -> vector<1x16x128xf32>
    "tpu.trace_stop"() : () -> ()
    %16 = arith.maximumf %12, %15 : vector<1x16x128xf32>
    %c0_17 = arith.constant 0 : index
    %c4 = arith.constant 4 : index
    %c0_18 = arith.constant 0 : index
    %c0_19 = arith.constant 0 : index
    %17 = vector.load %arg1[%c0_17, %c4, %c0_18, %c0_19] : memref<1x9x32x128xbf16, #tpu.memory_space<vmem>>, vector<1x1x32x128xbf16>
    %18 = vector.shape_cast %17 : vector<1x1x32x128xbf16> to vector<1x32x128xbf16>
    "tpu.trace_start"() <{level = 10 : i32, message = "bck,bkp->bcp"}> : () -> ()
    %cst_20 = arith.constant dense<0.000000e+00> : vector<1x16x128xf32>
    %19 = tpu.matmul %1, %18, %cst_20 {dimension_numbers = #tpu.dot_dimension_numbers<[2], [1], [1], [2], [0, 0, 0, 1, 1, 2], [0], [0]>} : vector<1x16x32xbf16>, vector<1x32x128xbf16>, vector<1x16x128xf32> -> vector<1x16x128xf32>
    "tpu.trace_stop"() : () -> ()
    %20 = arith.maximumf %16, %19 : vector<1x16x128xf32>
    %c0_21 = arith.constant 0 : index
    %c5 = arith.constant 5 : index
    %c0_22 = arith.constant 0 : index
    %c0_23 = arith.constant 0 : index
    %21 = vector.load %arg1[%c0_21, %c5, %c0_22, %c0_23] : memref<1x9x32x128xbf16, #tpu.memory_space<vmem>>, vector<1x1x32x128xbf16>
    %22 = vector.shape_cast %21 : vector<1x1x32x128xbf16> to vector<1x32x128xbf16>
    "tpu.trace_start"() <{level = 10 : i32, message = "bck,bkp->bcp"}> : () -> ()
    %cst_24 = arith.constant dense<0.000000e+00> : vector<1x16x128xf32>
    %23 = tpu.matmul %1, %22, %cst_24 {dimension_numbers = #tpu.dot_dimension_numbers<[2], [1], [1], [2], [0, 0, 0, 1, 1, 2], [0], [0]>} : vector<1x16x32xbf16>, vector<1x32x128xbf16>, vector<1x16x128xf32> -> vector<1x16x128xf32>
    "tpu.trace_stop"() : () -> ()
    %24 = arith.maximumf %20, %23 : vector<1x16x128xf32>
    %c0_25 = arith.constant 0 : index
    %c6 = arith.constant 6 : index
    %c0_26 = arith.constant 0 : index
    %c0_27 = arith.constant 0 : index
    %25 = vector.load %arg1[%c0_25, %c6, %c0_26, %c0_27] : memref<1x9x32x128xbf16, #tpu.memory_space<vmem>>, vector<1x1x32x128xbf16>
    %26 = vector.shape_cast %25 : vector<1x1x32x128xbf16> to vector<1x32x128xbf16>
    "tpu.trace_start"() <{level = 10 : i32, message = "bck,bkp->bcp"}> : () -> ()
    %cst_28 = arith.constant dense<0.000000e+00> : vector<1x16x128xf32>
    %27 = tpu.matmul %1, %26, %cst_28 {dimension_numbers = #tpu.dot_dimension_numbers<[2], [1], [1], [2], [0, 0, 0, 1, 1, 2], [0], [0]>} : vector<1x16x32xbf16>, vector<1x32x128xbf16>, vector<1x16x128xf32> -> vector<1x16x128xf32>
    "tpu.trace_stop"() : () -> ()
    %28 = arith.maximumf %24, %27 : vector<1x16x128xf32>
    %c0_29 = arith.constant 0 : index
    %c7 = arith.constant 7 : index
    %c0_30 = arith.constant 0 : index
    %c0_31 = arith.constant 0 : index
    %29 = vector.load %arg1[%c0_29, %c7, %c0_30, %c0_31] : memref<1x9x32x128xbf16, #tpu.memory_space<vmem>>, vector<1x1x32x128xbf16>
    %30 = vector.shape_cast %29 : vector<1x1x32x128xbf16> to vector<1x32x128xbf16>
    "tpu.trace_start"() <{level = 10 : i32, message = "bck,bkp->bcp"}> : () -> ()
    %cst_32 = arith.constant dense<0.000000e+00> : vector<1x16x128xf32>
    %31 = tpu.matmul %1, %30, %cst_32 {dimension_numbers = #tpu.dot_dimension_numbers<[2], [1], [1], [2], [0, 0, 0, 1, 1, 2], [0], [0]>} : vector<1x16x32xbf16>, vector<1x32x128xbf16>, vector<1x16x128xf32> -> vector<1x16x128xf32>
    "tpu.trace_stop"() : () -> ()
    %32 = arith.maximumf %28, %31 : vector<1x16x128xf32>
    %c0_33 = arith.constant 0 : index
    %c8 = arith.constant 8 : index
    %c0_34 = arith.constant 0 : index
    %c0_35 = arith.constant 0 : index
    %33 = vector.load %arg1[%c0_33, %c8, %c0_34, %c0_35] : memref<1x9x32x128xbf16, #tpu.memory_space<vmem>>, vector<1x1x32x128xbf16>
    %34 = vector.shape_cast %33 : vector<1x1x32x128xbf16> to vector<1x32x128xbf16>
    "tpu.trace_start"() <{level = 10 : i32, message = "bck,bkp->bcp"}> : () -> ()
    %cst_36 = arith.constant dense<0.000000e+00> : vector<1x16x128xf32>
    %35 = tpu.matmul %1, %34, %cst_36 {dimension_numbers = #tpu.dot_dimension_numbers<[2], [1], [1], [2], [0, 0, 0, 1, 1, 2], [0], [0]>} : vector<1x16x32xbf16>, vector<1x32x128xbf16>, vector<1x16x128xf32> -> vector<1x16x128xf32>
    "tpu.trace_stop"() : () -> ()
    %36 = arith.maximumf %32, %35 : vector<1x16x128xf32>
    %c0_37 = arith.constant 0 : index
    %c0_38 = arith.constant 0 : index
    %37 = vector.load %arg3[%c0_37, %c0_38] : memref<16x1xf32, #tpu.memory_space<vmem>>, vector<16x1xf32>
    %38 = vector.shape_cast %37 : vector<16x1xf32> to vector<1x16x1xf32>
    %39 = vector.broadcast %38 : vector<1x16x1xf32> to vector<1x16x128xf32>
    %40 = arith.addf %36, %39 : vector<1x16x128xf32>
    %cst_39 = arith.constant 0.000000e+00 : f32
    %41 = vector.broadcast %cst_39 : f32 to vector<1x16x128xf32>
    %42 = arith.maximumf %40, %41 : vector<1x16x128xf32>
    %43 = tpu.iota {dimensions = array<i32: 2>} : vector<1x16x128xi32>
    %c100_i32 = arith.constant 100 : i32
    %44 = vector.broadcast %c100_i32 : i32 to vector<1x16x128xi32>
    %45 = arith.cmpi slt, %43, %44 : vector<1x16x128xi32>
    %cst_40 = arith.constant 0.000000e+00 : f32
    %46 = vector.broadcast %cst_40 : f32 to vector<1x16x128xf32>
    %47 = arith.select %45, %42, %46 : vector<1x16x128xi1>, vector<1x16x128xf32>
    %c0_41 = arith.constant 0 : index
    %c0_42 = arith.constant 0 : index
    %c0_43 = arith.constant 0 : index
    %48 = vector.load %arg7[%c0_41, %c0_42, %c0_43] : memref<1x16x128xf32, #tpu.memory_space<vmem>>, vector<1x16x128xf32>
    tpu.vector_store %arg7[%c0_41, %c0_42, %c0_43], %47 {strides = array<i32>} : memref<1x16x128xf32, #tpu.memory_space<vmem>>, vector<1x16x128xf32>,
    %c0_44 = arith.constant 0 : index
    %c0_45 = arith.constant 0 : index
    %49 = vector.load %arg5[%c0_44, %c0_45] : memref<1x128xf32, #tpu.memory_space<vmem>>, vector<1x128xf32>
    %c0_46 = arith.constant 0 : index
    %c0_47 = arith.constant 0 : index
    %c0_48 = arith.constant 0 : index
    %50 = vector.load %arg7[%c0_46, %c0_47, %c0_48] : memref<1x16x128xf32, #tpu.memory_space<vmem>>, vector<1x1x128xf32>
    %51 = vector.shape_cast %50 : vector<1x1x128xf32> to vector<1x128xf32>
    %c0_49 = arith.constant 0 : index
    %c0_50 = arith.constant 0 : index
    %c0_51 = arith.constant 0 : index
    %52 = vector.load %arg4[%c0_49, %c0_50, %c0_51] : memref<16x128x128xf32, #tpu.memory_space<vmem>>, vector<1x128x128xf32>
    %53 = vector.shape_cast %52 : vector<1x128x128xf32> to vector<128x128xf32>
    %cst_52 = arith.constant dense<0.000000e+00> : vector<1x128xf32>
    %54 = tpu.matmul %51, %53, %cst_52 {dimension_numbers = #tpu.dot_dimension_numbers<[1], [0], [0], [1], [0, 0, 1, 1], [], []>} : vector<1x128xf32>, vector<128x128xf32>, vector<1x128xf32> -> vector<1x128xf32>
    %55 = arith.addf %49, %54 : vector<1x128xf32>
    %c0_53 = arith.constant 0 : index
    %c1_54 = arith.constant 1 : index
    %c0_55 = arith.constant 0 : index
    %56 = vector.load %arg7[%c0_53, %c1_54, %c0_55] : memref<1x16x128xf32, #tpu.memory_space<vmem>>, vector<1x1x128xf32>
    %57 = vector.shape_cast %56 : vector<1x1x128xf32> to vector<1x128xf32>
    %c1_56 = arith.constant 1 : index
    %c0_57 = arith.constant 0 : index
    %c0_58 = arith.constant 0 : index
    %58 = vector.load %arg4[%c1_56, %c0_57, %c0_58] : memref<16x128x128xf32, #tpu.memory_space<vmem>>, vector<1x128x128xf32>
    %59 = vector.shape_cast %58 : vector<1x128x128xf32> to vector<128x128xf32>
    %cst_59 = arith.constant dense<0.000000e+00> : vector<1x128xf32>
    %60 = tpu.matmul %57, %59, %cst_59 {dimension_numbers = #tpu.dot_dimension_numbers<[1], [0], [0], [1], [0, 0, 1, 1], [], []>} : vector<1x128xf32>, vector<128x128xf32>, vector<1x128xf32> -> vector<1x128xf32>
    %61 = arith.addf %55, %60 : vector<1x128xf32>
    %c0_60 = arith.constant 0 : index
    %c2_61 = arith.constant 2 : index
    %c0_62 = arith.constant 0 : index
    %62 = vector.load %arg7[%c0_60, %c2_61, %c0_62] : memref<1x16x128xf32, #tpu.memory_space<vmem>>, vector<1x1x128xf32>
    %63 = vector.shape_cast %62 : vector<1x1x128xf32> to vector<1x128xf32>
    %c2_63 = arith.constant 2 : index
    %c0_64 = arith.constant 0 : index
    %c0_65 = arith.constant 0 : index
    %64 = vector.load %arg4[%c2_63, %c0_64, %c0_65] : memref<16x128x128xf32, #tpu.memory_space<vmem>>, vector<1x128x128xf32>
    %65 = vector.shape_cast %64 : vector<1x128x128xf32> to vector<128x128xf32>
    %cst_66 = arith.constant dense<0.000000e+00> : vector<1x128xf32>
    %66 = tpu.matmul %63, %65, %cst_66 {dimension_numbers = #tpu.dot_dimension_numbers<[1], [0], [0], [1], [0, 0, 1, 1], [], []>} : vector<1x128xf32>, vector<128x128xf32>, vector<1x128xf32> -> vector<1x128xf32>
    %67 = arith.addf %61, %66 : vector<1x128xf32>
    %c0_67 = arith.constant 0 : index
    %c3_68 = arith.constant 3 : index
    %c0_69 = arith.constant 0 : index
    %68 = vector.load %arg7[%c0_67, %c3_68, %c0_69] : memref<1x16x128xf32, #tpu.memory_space<vmem>>, vector<1x1x128xf32>
    %69 = vector.shape_cast %68 : vector<1x1x128xf32> to vector<1x128xf32>
    %c3_70 = arith.constant 3 : index
    %c0_71 = arith.constant 0 : index
    %c0_72 = arith.constant 0 : index
    %70 = vector.load %arg4[%c3_70, %c0_71, %c0_72] : memref<16x128x128xf32, #tpu.memory_space<vmem>>, vector<1x128x128xf32>
    %71 = vector.shape_cast %70 : vector<1x128x128xf32> to vector<128x128xf32>
    %cst_73 = arith.constant dense<0.000000e+00> : vector<1x128xf32>
    %72 = tpu.matmul %69, %71, %cst_73 {dimension_numbers = #tpu.dot_dimension_numbers<[1], [0], [0], [1], [0, 0, 1, 1], [], []>} : vector<1x128xf32>, vector<128x128xf32>, vector<1x128xf32> -> vector<1x128xf32>
    %73 = arith.addf %67, %72 : vector<1x128xf32>
    %c0_74 = arith.constant 0 : index
    %c4_75 = arith.constant 4 : index
    %c0_76 = arith.constant 0 : index
    %74 = vector.load %arg7[%c0_74, %c4_75, %c0_76] : memref<1x16x128xf32, #tpu.memory_space<vmem>>, vector<1x1x128xf32>
    %75 = vector.shape_cast %74 : vector<1x1x128xf32> to vector<1x128xf32>
    %c4_77 = arith.constant 4 : index
    %c0_78 = arith.constant 0 : index
    %c0_79 = arith.constant 0 : index
    %76 = vector.load %arg4[%c4_77, %c0_78, %c0_79] : memref<16x128x128xf32, #tpu.memory_space<vmem>>, vector<1x128x128xf32>
    %77 = vector.shape_cast %76 : vector<1x128x128xf32> to vector<128x128xf32>
    %cst_80 = arith.constant dense<0.000000e+00> : vector<1x128xf32>
    %78 = tpu.matmul %75, %77, %cst_80 {dimension_numbers = #tpu.dot_dimension_numbers<[1], [0], [0], [1], [0, 0, 1, 1], [], []>} : vector<1x128xf32>, vector<128x128xf32>, vector<1x128xf32> -> vector<1x128xf32>
    %79 = arith.addf %73, %78 : vector<1x128xf32>
    %c0_81 = arith.constant 0 : index
    %c5_82 = arith.constant 5 : index
    %c0_83 = arith.constant 0 : index
    %80 = vector.load %arg7[%c0_81, %c5_82, %c0_83] : memref<1x16x128xf32, #tpu.memory_space<vmem>>, vector<1x1x128xf32>
    %81 = vector.shape_cast %80 : vector<1x1x128xf32> to vector<1x128xf32>
    %c5_84 = arith.constant 5 : index
    %c0_85 = arith.constant 0 : index
    %c0_86 = arith.constant 0 : index
    %82 = vector.load %arg4[%c5_84, %c0_85, %c0_86] : memref<16x128x128xf32, #tpu.memory_space<vmem>>, vector<1x128x128xf32>
    %83 = vector.shape_cast %82 : vector<1x128x128xf32> to vector<128x128xf32>
    %cst_87 = arith.constant dense<0.000000e+00> : vector<1x128xf32>
    %84 = tpu.matmul %81, %83, %cst_87 {dimension_numbers = #tpu.dot_dimension_numbers<[1], [0], [0], [1], [0, 0, 1, 1], [], []>} : vector<1x128xf32>, vector<128x128xf32>, vector<1x128xf32> -> vector<1x128xf32>
    %85 = arith.addf %79, %84 : vector<1x128xf32>
    %c0_88 = arith.constant 0 : index
    %c6_89 = arith.constant 6 : index
    %c0_90 = arith.constant 0 : index
    %86 = vector.load %arg7[%c0_88, %c6_89, %c0_90] : memref<1x16x128xf32, #tpu.memory_space<vmem>>, vector<1x1x128xf32>
    %87 = vector.shape_cast %86 : vector<1x1x128xf32> to vector<1x128xf32>
    %c6_91 = arith.constant 6 : index
    %c0_92 = arith.constant 0 : index
    %c0_93 = arith.constant 0 : index
    %88 = vector.load %arg4[%c6_91, %c0_92, %c0_93] : memref<16x128x128xf32, #tpu.memory_space<vmem>>, vector<1x128x128xf32>
    %89 = vector.shape_cast %88 : vector<1x128x128xf32> to vector<128x128xf32>
    %cst_94 = arith.constant dense<0.000000e+00> : vector<1x128xf32>
    %90 = tpu.matmul %87, %89, %cst_94 {dimension_numbers = #tpu.dot_dimension_numbers<[1], [0], [0], [1], [0, 0, 1, 1], [], []>} : vector<1x128xf32>, vector<128x128xf32>, vector<1x128xf32> -> vector<1x128xf32>
    %91 = arith.addf %85, %90 : vector<1x128xf32>
    %c0_95 = arith.constant 0 : index
    %c7_96 = arith.constant 7 : index
    %c0_97 = arith.constant 0 : index
    %92 = vector.load %arg7[%c0_95, %c7_96, %c0_97] : memref<1x16x128xf32, #tpu.memory_space<vmem>>, vector<1x1x128xf32>
    %93 = vector.shape_cast %92 : vector<1x1x128xf32> to vector<1x128xf32>
    %c7_98 = arith.constant 7 : index
    %c0_99 = arith.constant 0 : index
    %c0_100 = arith.constant 0 : index
    %94 = vector.load %arg4[%c7_98, %c0_99, %c0_100] : memref<16x128x128xf32, #tpu.memory_space<vmem>>, vector<1x128x128xf32>
    %95 = vector.shape_cast %94 : vector<1x128x128xf32> to vector<128x128xf32>
    %cst_101 = arith.constant dense<0.000000e+00> : vector<1x128xf32>
    %96 = tpu.matmul %93, %95, %cst_101 {dimension_numbers = #tpu.dot_dimension_numbers<[1], [0], [0], [1], [0, 0, 1, 1], [], []>} : vector<1x128xf32>, vector<128x128xf32>, vector<1x128xf32> -> vector<1x128xf32>
    %97 = arith.addf %91, %96 : vector<1x128xf32>
    %c0_102 = arith.constant 0 : index
    %c8_103 = arith.constant 8 : index
    %c0_104 = arith.constant 0 : index
    %98 = vector.load %arg7[%c0_102, %c8_103, %c0_104] : memref<1x16x128xf32, #tpu.memory_space<vmem>>, vector<1x1x128xf32>
    %99 = vector.shape_cast %98 : vector<1x1x128xf32> to vector<1x128xf32>
    %c8_105 = arith.constant 8 : index
    %c0_106 = arith.constant 0 : index
    %c0_107 = arith.constant 0 : index
    %100 = vector.load %arg4[%c8_105, %c0_106, %c0_107] : memref<16x128x128xf32, #tpu.memory_space<vmem>>, vector<1x128x128xf32>
    %101 = vector.shape_cast %100 : vector<1x128x128xf32> to vector<128x128xf32>
    %cst_108 = arith.constant dense<0.000000e+00> : vector<1x128xf32>
    %102 = tpu.matmul %99, %101, %cst_108 {dimension_numbers = #tpu.dot_dimension_numbers<[1], [0], [0], [1], [0, 0, 1, 1], [], []>} : vector<1x128xf32>, vector<128x128xf32>, vector<1x128xf32> -> vector<1x128xf32>
    %103 = arith.addf %97, %102 : vector<1x128xf32>
    %c0_109 = arith.constant 0 : index
    %c9 = arith.constant 9 : index
    %c0_110 = arith.constant 0 : index
    %104 = vector.load %arg7[%c0_109, %c9, %c0_110] : memref<1x16x128xf32, #tpu.memory_space<vmem>>, vector<1x1x128xf32>
    %105 = vector.shape_cast %104 : vector<1x1x128xf32> to vector<1x128xf32>
    %c9_111 = arith.constant 9 : index
    %c0_112 = arith.constant 0 : index
    %c0_113 = arith.constant 0 : index
    %106 = vector.load %arg4[%c9_111, %c0_112, %c0_113] : memref<16x128x128xf32, #tpu.memory_space<vmem>>, vector<1x128x128xf32>
    %107 = vector.shape_cast %106 : vector<1x128x128xf32> to vector<128x128xf32>
    %cst_114 = arith.constant dense<0.000000e+00> : vector<1x128xf32>
    %108 = tpu.matmul %105, %107, %cst_114 {dimension_numbers = #tpu.dot_dimension_numbers<[1], [0], [0], [1], [0, 0, 1, 1], [], []>} : vector<1x128xf32>, vector<128x128xf32>, vector<1x128xf32> -> vector<1x128xf32>
    %109 = arith.addf %103, %108 : vector<1x128xf32>
    %c0_115 = arith.constant 0 : index
    %c10 = arith.constant 10 : index
    %c0_116 = arith.constant 0 : index
    %110 = vector.load %arg7[%c0_115, %c10, %c0_116] : memref<1x16x128xf32, #tpu.memory_space<vmem>>, vector<1x1x128xf32>
    %111 = vector.shape_cast %110 : vector<1x1x128xf32> to vector<1x128xf32>
    %c10_117 = arith.constant 10 : index
    %c0_118 = arith.constant 0 : index
    %c0_119 = arith.constant 0 : index
    %112 = vector.load %arg4[%c10_117, %c0_118, %c0_119] : memref<16x128x128xf32, #tpu.memory_space<vmem>>, vector<1x128x128xf32>
    %113 = vector.shape_cast %112 : vector<1x128x128xf32> to vector<128x128xf32>
    %cst_120 = arith.constant dense<0.000000e+00> : vector<1x128xf32>
    %114 = tpu.matmul %111, %113, %cst_120 {dimension_numbers = #tpu.dot_dimension_numbers<[1], [0], [0], [1], [0, 0, 1, 1], [], []>} : vector<1x128xf32>, vector<128x128xf32>, vector<1x128xf32> -> vector<1x128xf32>
    %115 = arith.addf %109, %114 : vector<1x128xf32>
    %c0_121 = arith.constant 0 : index
    %c11 = arith.constant 11 : index
    %c0_122 = arith.constant 0 : index
    %116 = vector.load %arg7[%c0_121, %c11, %c0_122] : memref<1x16x128xf32, #tpu.memory_space<vmem>>, vector<1x1x128xf32>
    %117 = vector.shape_cast %116 : vector<1x1x128xf32> to vector<1x128xf32>
    %c11_123 = arith.constant 11 : index
    %c0_124 = arith.constant 0 : index
    %c0_125 = arith.constant 0 : index
    %118 = vector.load %arg4[%c11_123, %c0_124, %c0_125] : memref<16x128x128xf32, #tpu.memory_space<vmem>>, vector<1x128x128xf32>
    %119 = vector.shape_cast %118 : vector<1x128x128xf32> to vector<128x128xf32>
    %cst_126 = arith.constant dense<0.000000e+00> : vector<1x128xf32>
    %120 = tpu.matmul %117, %119, %cst_126 {dimension_numbers = #tpu.dot_dimension_numbers<[1], [0], [0], [1], [0, 0, 1, 1], [], []>} : vector<1x128xf32>, vector<128x128xf32>, vector<1x128xf32> -> vector<1x128xf32>
    %121 = arith.addf %115, %120 : vector<1x128xf32>
    %c0_127 = arith.constant 0 : index
    %c12 = arith.constant 12 : index
    %c0_128 = arith.constant 0 : index
    %122 = vector.load %arg7[%c0_127, %c12, %c0_128] : memref<1x16x128xf32, #tpu.memory_space<vmem>>, vector<1x1x128xf32>
    %123 = vector.shape_cast %122 : vector<1x1x128xf32> to vector<1x128xf32>
    %c12_129 = arith.constant 12 : index
    %c0_130 = arith.constant 0 : index
    %c0_131 = arith.constant 0 : index
    %124 = vector.load %arg4[%c12_129, %c0_130, %c0_131] : memref<16x128x128xf32, #tpu.memory_space<vmem>>, vector<1x128x128xf32>
    %125 = vector.shape_cast %124 : vector<1x128x128xf32> to vector<128x128xf32>
    %cst_132 = arith.constant dense<0.000000e+00> : vector<1x128xf32>
    %126 = tpu.matmul %123, %125, %cst_132 {dimension_numbers = #tpu.dot_dimension_numbers<[1], [0], [0], [1], [0, 0, 1, 1], [], []>} : vector<1x128xf32>, vector<128x128xf32>, vector<1x128xf32> -> vector<1x128xf32>
    %127 = arith.addf %121, %126 : vector<1x128xf32>
    %c0_133 = arith.constant 0 : index
    %c13 = arith.constant 13 : index
    %c0_134 = arith.constant 0 : index
    %128 = vector.load %arg7[%c0_133, %c13, %c0_134] : memref<1x16x128xf32, #tpu.memory_space<vmem>>, vector<1x1x128xf32>
    %129 = vector.shape_cast %128 : vector<1x1x128xf32> to vector<1x128xf32>
    %c13_135 = arith.constant 13 : index
    %c0_136 = arith.constant 0 : index
    %c0_137 = arith.constant 0 : index
    %130 = vector.load %arg4[%c13_135, %c0_136, %c0_137] : memref<16x128x128xf32, #tpu.memory_space<vmem>>, vector<1x128x128xf32>
    %131 = vector.shape_cast %130 : vector<1x128x128xf32> to vector<128x128xf32>
    %cst_138 = arith.constant dense<0.000000e+00> : vector<1x128xf32>
    %132 = tpu.matmul %129, %131, %cst_138 {dimension_numbers = #tpu.dot_dimension_numbers<[1], [0], [0], [1], [0, 0, 1, 1], [], []>} : vector<1x128xf32>, vector<128x128xf32>, vector<1x128xf32> -> vector<1x128xf32>
    %133 = arith.addf %127, %132 : vector<1x128xf32>
    %c0_139 = arith.constant 0 : index
    %c14 = arith.constant 14 : index
    %c0_140 = arith.constant 0 : index
    %134 = vector.load %arg7[%c0_139, %c14, %c0_140] : memref<1x16x128xf32, #tpu.memory_space<vmem>>, vector<1x1x128xf32>
    %135 = vector.shape_cast %134 : vector<1x1x128xf32> to vector<1x128xf32>
    %c14_141 = arith.constant 14 : index
    %c0_142 = arith.constant 0 : index
    %c0_143 = arith.constant 0 : index
    %136 = vector.load %arg4[%c14_141, %c0_142, %c0_143] : memref<16x128x128xf32, #tpu.memory_space<vmem>>, vector<1x128x128xf32>
    %137 = vector.shape_cast %136 : vector<1x128x128xf32> to vector<128x128xf32>
    %cst_144 = arith.constant dense<0.000000e+00> : vector<1x128xf32>
    %138 = tpu.matmul %135, %137, %cst_144 {dimension_numbers = #tpu.dot_dimension_numbers<[1], [0], [0], [1], [0, 0, 1, 1], [], []>} : vector<1x128xf32>, vector<128x128xf32>, vector<1x128xf32> -> vector<1x128xf32>
    %139 = arith.addf %133, %138 : vector<1x128xf32>
    %c0_145 = arith.constant 0 : index
    %c15 = arith.constant 15 : index
    %c0_146 = arith.constant 0 : index
    %140 = vector.load %arg7[%c0_145, %c15, %c0_146] : memref<1x16x128xf32, #tpu.memory_space<vmem>>, vector<1x1x128xf32>
    %141 = vector.shape_cast %140 : vector<1x1x128xf32> to vector<1x128xf32>
    %c15_147 = arith.constant 15 : index
    %c0_148 = arith.constant 0 : index
    %c0_149 = arith.constant 0 : index
    %142 = vector.load %arg4[%c15_147, %c0_148, %c0_149] : memref<16x128x128xf32, #tpu.memory_space<vmem>>, vector<1x128x128xf32>
    %143 = vector.shape_cast %142 : vector<1x128x128xf32> to vector<128x128xf32>
    %cst_150 = arith.constant dense<0.000000e+00> : vector<1x128xf32>
    %144 = tpu.matmul %141, %143, %cst_150 {dimension_numbers = #tpu.dot_dimension_numbers<[1], [0], [0], [1], [0, 0, 1, 1], [], []>} : vector<1x128xf32>, vector<128x128xf32>, vector<1x128xf32> -> vector<1x128xf32>
    %145 = arith.addf %139, %144 : vector<1x128xf32>
    %c0_151 = arith.constant 0 : index
    %c0_152 = arith.constant 0 : index
    %c0_153 = arith.constant 0 : index
    %146 = vector.load %arg6[%c0_151, %c0_152, %c0_153] : memref<1x1x128xf32, #tpu.memory_space<vmem>>, vector<1x1x128xf32>
    %147 = vector.shape_cast %146 : vector<1x1x128xf32> to vector<1x128xf32>
    %148 = vector.shape_cast %145 : vector<1x128xf32> to vector<1x1x128xf32>
    tpu.vector_store %arg6[%c0_151, %c0_152, %c0_153], %148 {strides = array<i32>} : memref<1x1x128xf32, #tpu.memory_space<vmem>>, vector<1x1x128xf32>,
    return
  }
  func.func @transform_0(%arg0: i32) -> (i32, i32, i32, i32) {
    %c0_i32 = arith.constant 0 : i32
    %c0_i32_0 = arith.constant 0 : i32
    %c0_i32_1 = arith.constant 0 : i32
    %c0_i32_2 = arith.constant 0 : i32
    return %arg0, %c0_i32, %c0_i32_0, %c0_i32_1 : i32, i32, i32, i32
  }
  func.func @transform_1(%arg0: i32) -> (i32, i32) {
    %c0_i32 = arith.constant 0 : i32
    %c0_i32_0 = arith.constant 0 : i32
    %c0_i32_1 = arith.constant 0 : i32
    return %c0_i32, %c0_i32_0 : i32, i32
  }
  func.func @transform_2(%arg0: i32) -> (i32, i32) {
    %c0_i32 = arith.constant 0 : i32
    %c0_i32_0 = arith.constant 0 : i32
    %c0_i32_1 = arith.constant 0 : i32
    return %c0_i32, %c0_i32_0 : i32, i32
  }
  func.func @transform_3(%arg0: i32) -> (i32, i32, i32) {
    %c0_i32 = arith.constant 0 : i32
    %c0_i32_0 = arith.constant 0 : i32
    %c0_i32_1 = arith.constant 0 : i32
    %c0_i32_2 = arith.constant 0 : i32
    return %c0_i32, %c0_i32_0, %c0_i32_1 : i32, i32, i32
  }
  func.func @transform_4(%arg0: i32) -> (i32, i32) {
    %c0_i32 = arith.constant 0 : i32
    %c0_i32_0 = arith.constant 0 : i32
    %c0_i32_1 = arith.constant 0 : i32
    return %c0_i32, %c0_i32_0 : i32, i32
  }
  func.func @transform_5(%arg0: i32) -> (i32, i32, i32) {
    %c0_i32 = arith.constant 0 : i32
    %c0_i32_0 = arith.constant 0 : i32
    %c0_i32_1 = arith.constant 0 : i32
    return %arg0, %c0_i32, %c0_i32_0 : i32, i32, i32
  }
}

</mosaic_0001>

<bundles_post_ra>
// kernel: tpu_custom_call.1
= control target key start
LH: loop header
LB: loop body
LE: loop exit
PB: predicated region body
PF: predicated region fallthrough
CT: control target
= control target key end

     0   :  { %10 = vsyncpa [#allocation4], 0  ;;  %s4465_s0 = inlined_call_operand.hbm [shape: bf16[2,9,32,128], index: 0, kind: input, shape index: {}]   ;;  %s4466_s1 = inlined_call_operand.vmem [shape: bf16[16,32], index: 1, kind: input, shape index: {}]   ;;  %s4467_s2 = inlined_call_operand.vmem [shape: f32[16,1], index: 2, kind: input, shape index: {}]   ;;  %s4468_s3 = inlined_call_operand.hbm [shape: f32[16,128,128], index: 3, kind: input, shape index: {}]   ;;  %s4469_s4 = inlined_call_operand.vmem [shape: f32[1,128], index: 4, kind: input, shape index: {}]   ;;  %s4470_s5 = inlined_call_operand.hbm [shape: f32[2,1,128], index: 5, kind: output, shape index: {}]  }
   0x1   :  { %12 = vsyncpa [#allocation4 + $0x1], 0 }
   0x2   :  { %13 = vsyncpa [#allocation7], 0 }
   0x3   :  { %14 = vsyncpa [#allocation5], 0 }
   0x4   :  { %16 = vsyncpa [#allocation5 + $0x1], 0  ;;  %s4017_s18 = smov 0   ;;  %s4019_s19 = smov 0  }
   0x5   :  { %s4021_s20 = smov 0   ;;  %s4023_s21 = smov 0  }
   0x6 LB: > { %s4038_s22 = sadd.s32 4294967295, %s3974_s21   ;;  %s2343_s23 = sadd.s32 4294967294, %s3974_s21   ;;  %s3974_s21 = sphi %s4023_s21, %s4490_s21   ;;  %s3970_s20 = sphi %s4021_s20, %s4489_s20   ;;  %s3966_s19 = sphi %s4019_s19, %s4488_s19   ;;  %s3962_s18 = sphi %s4017_s18, %s4487_s18  }
   0x7   : > { %p42_p0 = scmp.ne.s32.totalorder %s3966_s19, %s3962_s18  ;;  %p4471_p1 = scmp.eq.s32.totalorder %s4038_s22, 0 }
   0x8   : > { %p156_p3 = scmp.eq.s32.totalorder %s2343_s23, 1  ;;  %p2344_p5 = scmp.ge.s32.totalorder %s3974_s21, 1 }
   0x9   : > { %p4047_p4 = por %p4471_p1, %p42_p0  ;;  %p163_p7 = scmp.lt.s32.totalorder %s3974_s21, 3 }
   0xa   : > { %p4052_p6 = por %p156_p3, %p42_p0  ;;  %s3976_s27 = smov [#allocation6]  }
   0xb   : > { %s4474_s24 = scalar_select %p4047_p4, 1, 0 }
   0xc   : > { %s4475_s25 = scalar_select %p4052_p6, 1, 0 }
   0xd   : > { %p4057_p8 = pnand %p2344_p5, %p163_p7  ;;  %s181_s28 = sshll.u32 %s3976_s27, 4  ;;  %s4061_s28 = int_to_ptr.vmem [resolvable:$true] %s181_s28 }
   0xe   : > { %s4073_s30 = sadd.s32 1, %s3974_s21   ;;  %s29_s6 = sadd.s32 1, %s3970_s20 }
   0xf   : > { %s4476_s26 = scalar_select %p4057_p8, 1, 0 }
  0x10   : > { %p3769_p9 = pneg %p4057_p8  ;;  %s26_s7 = ssub.s32 %s3974_s21, %s4073_s30 }
  0x11   : > { %s3846_s10 = scalar_lea.hbm %s4468_s3, 32768 }
  0x12   : > { %p4068_p11 = pnand %p3769_p9, %p4471_p1  ;;  %p3847_p12 = scmp.ne.s32.totalorder %s4468_s3, %s3846_s10 }
  0x13   : > { %p3853_p5 = scmp.lt.u32.totalorder %s3846_s10, %s4468_s3 }
  0x14   : > { %p3848_p13 = pneg %p4068_p11 }
  0x16   : > { %p3849_p0 = pnand %p3848_p13, %p3847_p12 }
  0x18   : > { %p3850_p3 = pneg %p3849_p0 }
  0x1a   : > { %p3855_p7 = pnand %p3853_p5, %p3850_p3 }
  0x1c   : > { %3858 = shalt.err (!%p3855_p7)
}
  0x1d   : > { %s3859_s15 = scalar_lea.vmem %s4061_s28, 32768  ;;  %p3867_p2 = scmp.lt.s32.totalorder %s4061_s28, %s4061_s28 }
  0x1e   : > { %p3860_p9 = scmp.ne.s32.totalorder %s4061_s28, %s3859_s15  ;;  %p3868_p6 = scmp.lt.s32.totalorder %s3859_s15, %s3859_s15 }
  0x20   : > { %p3862_p10 = pnand %p3860_p9, %p3848_p13  ;;  %p3869_p4 = por %p3868_p6, %p3867_p2 }
  0x22   : > { %p3863_p1 = pneg %p3862_p10 }
  0x24   : > { %p3870_p8 = pnand %p3869_p4, %p3863_p1 }
  0x26   : > { %3873 = shalt.err (!%p3870_p8)
}
  0x27   : > { %s3977_s16 = smov 128   ;;  %s3978_s17 = smov 8  }
  0x28   : > { %3772 = dma.hbm_to_vmem [thread:$0]  (!%p4068_p11), %s4468_s3, 32768, %s4061_s28, [#allocation7], %s3977_s16, %s3977_s16, %s3978_s17  }
  0x29   : > { %p27_p2 = scmp.eq.s32.totalorder %s26_s7, 0  ;;  %p36_p1 = scmp.ne.s32.totalorder %s3970_s20, %s3966_s19 }
  0x2a   : > { %p37_p4 = scmp.eq.s32.totalorder %s3974_s21, 0  ;;  %p3782_p6 = scmp.lt.s32.totalorder %s3974_s21, 2 }
  0x2b   : > { %s4104_s8 = scalar_select %p27_p2, %s3970_s20, %s29_s6  }
  0x2c   : > { %p38_p8 = por %p37_p4, %p36_p1  ;;  %p4478_p10 = scmp.eq.s32.totalorder %s4038_s22, 1 }
  0x2d   : > { %s198_s10 = sand.u32 1, %s3970_s20   ;;  %s3759_s11 = smul.u32 2304, %s3974_s21 }
  0x2e   : > { %p4108_p12 = por %p4478_p10, %p36_p1  ;;  %s3758_s12 = smul.u32 144, %s198_s10 }
  0x2f   : > { %s4117_s14 = scalar_lea.hbm %s4465_s0, %s3759_s11  ;;  %p4119_p11 = pnand %p3782_p6, %p38_p8 }
  0x30   : > { %s202_s6 = scalar_lea.vmem [#allocation3], %s3758_s12  ;;  %s4125_s15 = scalar_lea.sflag [#allocation4], %s198_s10 }
  0x31   : > { %s209_s7 = sshll.u32 %s202_s6, 4  ;;  %s3874_s16 = scalar_lea.hbm %s4117_s14, 2304  ;;  %s4123_s7 = int_to_ptr.vmem [resolvable:$true] %s209_s7 }
  0x32   : > { %p3875_p13 = scmp.ne.s32.totalorder %s4117_s14, %s3874_s16  ;;  %p3876_p0 = pneg %p4119_p11 }
  0x33   : > { %s3879_s27 = scalar_lea.hbm %s4465_s0, 4608  ;;  %p3880_p7 = scmp.lt.u32.totalorder %s4117_s14, %s4465_s0 }
  0x34   : > { %p3877_p3 = pnand %p3876_p0, %p3875_p13  ;;  %p3881_p9 = scmp.lt.u32.totalorder %s3879_s27, %s3874_s16 }
  0x35   : > { %p3883_p1 = scmp.lt.u32.totalorder %s3874_s16, %s4117_s14 }
  0x36   : > { %p3878_p5 = pneg %p3877_p3  ;;  %p3882_p2 = por %p3881_p9, %p3880_p7 }
  0x38   : > { %p3884_p4 = por %p3883_p1, %p3882_p2 }
  0x3a   : > { %p3885_p6 = pnand %p3884_p4, %p3878_p5 }
  0x3c   : > { %3888 = shalt.err (!%p3885_p6)
}
  0x3d   : > { %s3889_s10 = scalar_lea.vmem %s4123_s7, 2304  ;;  %s3979_s12 = smov [#allocation3]  }
  0x3e   : > { %p3890_p8 = scmp.ne.s32.totalorder %s4123_s7, %s3889_s10  ;;  %s3894_s13 = sshll.u32 %s3979_s12, 4  ;;  %s3895_s13 = int_to_ptr.vmem [resolvable:$false] %s3894_s13 }
  0x3f   : > { %s3896_s6 = scalar_lea.vmem %s3895_s13, 4608  ;;  %p3897_p3 = scmp.lt.s32.totalorder %s4123_s7, %s3895_s13 }
  0x40   : > { %p3892_p10 = pnand %p3890_p8, %p3876_p0  ;;  %p3898_p7 = scmp.lt.s32.totalorder %s3896_s6, %s3889_s10 }
  0x42   : > { %p3893_p13 = pneg %p3892_p10  ;;  %p3899_p9 = por %p3898_p7, %p3897_p3 }
  0x44   : > { %p3900_p2 = pnand %p3899_p9, %p3893_p13 }
  0x46   : > { %3903 = shalt.err (!%p3900_p2)
}
  0x47   : > { %s3980_s16 = smov 64   ;;  %s3981_s17 = smov 4  }
  0x48   : > { %3776 = dma.hbm_to_vmem [thread:$0]  (!%p4119_p11), %s4117_s14, 2304, %s4123_s7, %s4125_s15, %s3980_s16, %s3980_s16, %s3981_s17  }
  0x49   : > { %p4481_p0 = scmp.ne.s32.totalorder %s4476_s26, 0 }
  0x4a   : > { %s4156_s23 = sand.u32 (!%p4481_p0), 1, %s3966_s19   ;;  %p4482_p5 = scmp.ne.s32.totalorder (!%p4481_p0), %s4474_s24, 0 }
  0x4b   : > { %221 = sbr.rel (%p4481_p0) target bundleno = 809 (0x329), region = 40  ;;  %s224_s11 = scalar_lea.sflag (!%p4481_p0), [#allocation4], %s4156_s23 }
  0x4c   : > { %s3760_s27 = smul.u32 (!%p4481_p0), 144, %s4156_s23 }
  0x4e   : > { %s4160_s29 = scalar_lea.vmem (!%p4481_p0), [#allocation3], %s3760_s27 }
  0x52   : > { %3949 = dma.done.wait (%p4482_p5), %s224_s11, 2304  }
  0x53   : > { %3951 = vsyncadd (%p4482_p5), %s224_s11, 4294964992  ;;  %p4483_p11 = scmp.eq.s32.totalorder %s4038_s22, 0 }
  0x55   : > { %3953 = dma.done.wait (%p4483_p11), [#allocation7], 32768   ;;  %p4484_p1 = pmov %p4483_p11 }
  0x56   : > { %v3982_v0 = vmov 0.0   ;;  %vm3983_vm0 = vmmov 0   ;;  %v3984_v1 = vmov 0   ;;  %v3827_v2 = vld [vmem:[%s4160_s29] sm:$0xff]   ;;  %v3828_v3 = vld [vmem:[%s4160_s29 + $0x10] sm:$0xff]   ;;  %v3829_v4 = vld [vmem:[%s4160_s29 + $0x8] sm:$0xff]  }
  0x57   : > { %3955 = vsyncadd (%p4484_p1), [#allocation7], 4294934528  ;;  %2712 = vmatprep.subr.bf16.mxu0 %v3982_v0  ;;  %2720 = vmatprep.subr.bf16.mxu1 %v3982_v0  ;;  %v3830_v5 = vld [vmem:[%s4160_s29 + $0x18] sm:$0xff]   ;;  %v4185_v6 = vld [vmem:[%s4466_s1] sm:$0xff]   ;;  %vm281_vm1 = vcmask 261120   ;;  %v3985_v23 = vmov 0.0|0.0  }
  0x58   : > { %2716 = vmatprep.mubr.msk.bf16.mxu0 %vm3983_vm0, %v3982_v0  ;;  %2724 = vmatprep.mubr.msk.bf16.mxu1 %vm3983_vm0, %v3982_v0  ;;  %v3832_v7 = vld [vmem:[%s4160_s29 + $0x20] sm:$0xff]   ;;  %v3833_v8 = vld [vmem:[%s4160_s29 + $0x30] sm:$0xff]   ;;  %v3834_v9 = vld [vmem:[%s4160_s29 + $0x28] sm:$0xff]   ;;  %s2410_s13 = sshll.u32 %s4038_s22, 4  ;;  %s256_s6 = scalar_lea.vmem [#allocation8], %s4156_s23 }
  0x59   : > { %3826 = vset.pattern.permute.xlu0 %v3984_v1  ;;  %2713 = vmatpush3.bf16.msra.mxu0 %v3827_v2  ;;  %v3835_v10 = vld [vmem:[%s4160_s29 + $0x38] sm:$0xff]   ;;  %v3836_v11 = vld [vmem:[%s4160_s29 + $0x40] sm:$0xff]   ;;  %v3837_v12 = vld [vmem:[%s4160_s29 + $0x50] sm:$0xff]   ;;  %s2267_s16 = sshll.u32 %s256_s6, 4  ;;  %s4421_s11 = scalar_lea.hbm %s4470_s5, %s2410_s13  ;;  %s4423_s16 = int_to_ptr.vmem [resolvable:$true] %s2267_s16 }
  0x5a   : > { %2721 = vmatpush3.bf16.msra.mxu1 %v3828_v3  ;;  %2714 = vmatprep.subr.bf16.mxu0 %v3982_v0  ;;  %v3838_v13 = vld [vmem:[%s4160_s29 + $0x48] sm:$0xff]   ;;  %v3839_v14 = vld [vmem:[%s4160_s29 + $0x58] sm:$0xff]   ;;  %v806_v15 = vld [vmem:[%s4467_s2] sm:$0xff]  ;;  %s3904_s22 = scalar_lea.vmem %s4423_s16, 16  ;;  %s3986_s24 = smov [#allocation8]  }
  0x5b   : > { %2722 = vmatprep.subr.bf16.mxu1 %v3982_v0  ;;  %810 = vperm.xlu0 %3826, %v806_v15   ;;  %v3840_v16 = vld [vmem:[%s4160_s29 + $0x60] sm:$0xff]   ;;  %v807_v17 = vld [vmem:[%s4467_s2 + $0x8] sm:$0xff]  ;;  %v3841_v18 = vld [vmem:[%s4160_s29 + $0x70] sm:$0xff]   ;;  %p3905_p4 = scmp.ne.s32.totalorder %s4423_s16, %s3904_s22  ;;  %s3908_s26 = sshll.u32 %s3986_s24, 4  ;;  %s3909_s26 = int_to_ptr.vmem [resolvable:$false] %s3908_s26 }
  0x5c   : > { %v3842_v19 = vld [vmem:[%s4160_s29 + $0x68] sm:$0xff]   ;;  %v3843_v20 = vld [vmem:[%s4160_s29 + $0x78] sm:$0xff]   ;;  %v3844_v21 = vld [vmem:[%s4160_s29 + $0x80] sm:$0xff]   ;;  %s3910_s14 = scalar_lea.vmem %s3909_s26, 32  ;;  %p3911_p10 = scmp.lt.s32.totalorder %s4423_s16, %s3909_s26 }
  0x5d   : > { %2715 = vmatpush3.bf16.msra.mxu0 %v3829_v4  ;;  %v3845_v22 = vld [vmem:[%s4160_s29 + $0x88] sm:$0xff]   ;;  %v831_v24 = vld [vmem:[#allocation6] sm:$0xff]  ;;  %v833_v30 = vld [vmem:[#allocation6 + $0x10] sm:$0xff]  ;;  %s2255_s29 = scalar_lea.sflag [#allocation5], %s4156_s23  ;;  %p3906_p6 = pnand %p3905_p4, %p4108_p12 }
  0x5e   : > { %2723 = vmatpush3.bf16.msra.mxu1 %v3830_v5  ;;  %2728 = vmatprep.subr.bf16.mxu0 %v3982_v0  ;;  %v832_v25 = vld [vmem:[#allocation6 + $0x8] sm:$0xff]  ;;  %v1543_v27 = vld [vmem:[#allocation6 + $0x400] sm:$0xff]  ;;  %v834_v31 = vld [vmem:[#allocation6 + $0x18] sm:$0xff]  ;;  %p3912_p13 = scmp.lt.s32.totalorder %s3910_s14, %s3904_s22 }
  0x5f   : > { %2736 = vmatprep.subr.bf16.mxu1 %v3982_v0  ;;  %815 = vperm.xlu0 %3826, %v807_v17   ;;  %v3345_v26 = vpack.c.bf16 %v832_v25, %v831_v24  ;;  %v1544_v28 = vld [vmem:[#allocation6 + $0x408] sm:$0xff]  ;;  %v3348_v32 = vpack.c.bf16 %v834_v31, %v833_v30  ;;  %v1545_v33 = vld [vmem:[#allocation6 + $0x410] sm:$0xff]  ;;  %v1546_v34 = vld [vmem:[#allocation6 + $0x418] sm:$0xff]  ;;  %p3907_p8 = pneg %p3906_p6 }
  0x60   : > { %2717 = vmatmul.mubr.msk.bf16.vlgmr.msra.gmra.mrb[0].mxu0 %vm281_vm1, %v4185_v6  ;;  %v3537_v29 = vpack.c.bf16 %v1544_v28, %v1543_v27  ;;  %v3540_v35 = vpack.c.bf16 %v1546_v34, %v1545_v33  ;;  %v835_v36 = vld [vmem:[#allocation6 + $0x20] sm:$0xff]  ;;  %v836_v37 = vld [vmem:[#allocation6 + $0x28] sm:$0xff]  ;;  %v837_v42 = vld [vmem:[#allocation6 + $0x30] sm:$0xff]  ;;  %p3913_p3 = por %p3912_p13, %p3911_p10 }
  0x61   : > { %2725 = vmatmul.mubr.msk.bf16.vlgmr.msra.gmra.mrb[0].mxu1 %vm281_vm1, %v4185_v6  ;;  %2729 = vmatpush3.bf16.msra.mxu0 %v3832_v7  ;;  %v3351_v38 = vpack.c.bf16 %v836_v37, %v835_v36  ;;  %v1547_v39 = vld [vmem:[#allocation6 + $0x420] sm:$0xff]  ;;  %v1548_v40 = vld [vmem:[#allocation6 + $0x428] sm:$0xff]  ;;  %v838_v43 = vld [vmem:[#allocation6 + $0x38] sm:$0xff] }
  0x62   : > { %2737 = vmatpush3.bf16.msra.mxu1 %v3833_v8  ;;  %2730 = vmatprep.subr.bf16.mxu0 %v3982_v0  ;;  %v3543_v41 = vpack.c.bf16 %v1548_v40, %v1547_v39  ;;  %v3354_v44 = vpack.c.bf16 %v838_v43, %v837_v42  ;;  %v1549_v45 = vld [vmem:[#allocation6 + $0x430] sm:$0xff]  ;;  %v1550_v46 = vld [vmem:[#allocation6 + $0x438] sm:$0xff]  ;;  %v839_v48 = vld [vmem:[#allocation6 + $0x40] sm:$0xff]  ;;  %p3914_p7 = pnand %p3913_p3, %p3907_p8 }
  0x63   : > { %2738 = vmatprep.subr.bf16.mxu1 %v3982_v0  ;;  %2732 = vmatprep.mubr.msk.bf16.mxu0 %vm3983_vm0, %v3982_v0  ;;  %v3546_v47 = vpack.c.bf16 %v1550_v46, %v1549_v45  ;;  %v840_v49 = vld [vmem:[#allocation6 + $0x48] sm:$0xff]  ;;  %v1551_v51 = vld [vmem:[#allocation6 + $0x440] sm:$0xff]  ;;  %v841_v54 = vld [vmem:[#allocation6 + $0x50] sm:$0xff] }
  0x64   : > { %2740 = vmatprep.mubr.msk.bf16.mxu1 %vm3983_vm0, %v3982_v0  ;;  %v3357_v50 = vpack.c.bf16 %v840_v49, %v839_v48  ;;  %v1552_v52 = vld [vmem:[#allocation6 + $0x448] sm:$0xff]  ;;  %v842_v55 = vld [vmem:[#allocation6 + $0x58] sm:$0xff]  ;;  %v1553_v57 = vld [vmem:[#allocation6 + $0x450] sm:$0xff] }
  0x65   : > { %2731 = vmatpush3.bf16.msra.mxu0 %v3834_v9  ;;  %v3549_v53 = vpack.c.bf16 %v1552_v52, %v1551_v51  ;;  %v3360_v56 = vpack.c.bf16 %v842_v55, %v841_v54  ;;  %v1554_v58 = vld [vmem:[#allocation6 + $0x458] sm:$0xff]  ;;  %v843_v60 = vld [vmem:[#allocation6 + $0x60] sm:$0xff]  ;;  %v844_v61 = vld [vmem:[#allocation6 + $0x68] sm:$0xff]  ;;  %v822_v55 = vlaneseq }
  0x66   : > { %2739 = vmatpush3.bf16.msra.mxu1 %v3835_v10  ;;  %2744 = vmatprep.subr.bf16.mxu0 %v3982_v0  ;;  %v3552_v59 = vpack.c.bf16 %v1554_v58, %v1553_v57  ;;  %v3363_v62 = vpack.c.bf16 %v844_v61, %v843_v60  ;;  %v1555_v63 = vld [vmem:[#allocation6 + $0x460] sm:$0xff]  ;;  %v1556_v1 = vld [vmem:[#allocation6 + $0x468] sm:$0xff]  ;;  %v845_v3 = vld [vmem:[#allocation6 + $0x70] sm:$0xff] }
  0x67   : > { %2752 = vmatprep.subr.bf16.mxu1 %v3982_v0  ;;  %v3555_v2 = vpack.c.bf16 %v1556_v1, %v1555_v63  ;;  %v846_v4 = vld [vmem:[#allocation6 + $0x78] sm:$0xff]  ;;  %v1557_v5 = vld [vmem:[#allocation6 + $0x470] sm:$0xff] }
  0x68   : > { %2733 = vmatmul.mubr.msk.bf16.vlgmr.msra.gmra.mrb[4].mxu0 %vm281_vm1, %v4185_v6  ;;  %v1558_v7 = vld [vmem:[#allocation6 + $0x478] sm:$0xff] }
  0x69   : > { %2745 = vmatpush3.bf16.msra.mxu0 %v3836_v11  ;;  %2741 = vmatmul.mubr.msk.bf16.vlgmr.msra.gmra.mrb[4].mxu1 %vm281_vm1, %v4185_v6  ;;  %v3558_v8 = vpack.c.bf16 %v1558_v7, %v1557_v5 }
  0x6a   : > { %2753 = vmatpush3.bf16.msra.mxu1 %v3837_v12  ;;  %2746 = vmatprep.subr.bf16.mxu0 %v3982_v0 }
  0x6b   : > { %2754 = vmatprep.subr.bf16.mxu1 %v3982_v0  ;;  %2748 = vmatprep.mubr.msk.bf16.mxu0 %vm3983_vm0, %v3982_v0 }
  0x6c   : > { %2756 = vmatprep.mubr.msk.bf16.mxu1 %vm3983_vm0, %v3982_v0 }
  0x6d   : > { %2747 = vmatpush3.bf16.msra.mxu0 %v3838_v13 }
  0x6e   : > { %2755 = vmatpush3.bf16.msra.mxu1 %v3839_v14  ;;  %2760 = vmatprep.subr.bf16.mxu0 %v3982_v0 }
  0x6f   : > { %2768 = vmatprep.subr.bf16.mxu1 %v3982_v0 }
  0x70   : > { %2749 = vmatmul.mubr.msk.bf16.vlgmr.msra.gmra.mrb[8].mxu0 %vm281_vm1, %v4185_v6 }
  0x71   : > { %2761 = vmatpush3.bf16.msra.mxu0 %v3840_v16  ;;  %2757 = vmatmul.mubr.msk.bf16.vlgmr.msra.gmra.mrb[8].mxu1 %vm281_vm1, %v4185_v6 }
  0x72   : > { %2769 = vmatpush3.bf16.msra.mxu1 %v3841_v18  ;;  %2762 = vmatprep.subr.bf16.mxu0 %v3982_v0 }
  0x73   : > { %2770 = vmatprep.subr.bf16.mxu1 %v3982_v0  ;;  %2764 = vmatprep.mubr.msk.bf16.mxu0 %vm3983_vm0, %v3982_v0 }
  0x74   : > { %2772 = vmatprep.mubr.msk.bf16.mxu1 %vm3983_vm0, %v3982_v0 }
  0x75   : > { %2763 = vmatpush3.bf16.msra.mxu0 %v3842_v19 }
  0x76   : > { %2771 = vmatpush3.bf16.msra.mxu1 %v3843_v20  ;;  %2776 = vmatprep.subr.bf16.mxu0 %v3982_v0 }
  0x77   : > { %3536 = vmatprep.subr.bf16.mxu1 %v3985_v23 }
  0x78   : > { %2765 = vmatmul.mubr.msk.bf16.vlgmr.msra.gmra.mrb[12].mxu0 %vm281_vm1, %v4185_v6 }
  0x79   : > { %2777 = vmatpush3.bf16.msra.mxu0 %v3844_v21  ;;  %2773 = vmatmul.mubr.msk.bf16.vlgmr.msra.gmra.mrb[12].mxu1 %vm281_vm1, %v4185_v6 }
  0x7a   : > { %2778 = vmatprep.subr.bf16.mxu0 %v3982_v0  ;;  %2780 = vmatprep.mubr.msk.bf16.mxu0 %vm3983_vm0, %v3982_v0 }
  0x7b   : > { %3096 = vmatprep.mubr.msk.f32.mxu1 %vm3983_vm0, %v3982_v0  ;;  %3538 = vmatpush3.bf16.msra.mxu1 %v3537_v29 }
  0x7c   : > { %3539 = vmatprep.subr.bf16.mxu1 %v3985_v23 }
  0x7d   : > { %2779 = vmatpush3.bf16.msra.mxu0 %v3845_v22 }
  0x7e   : > { %3344 = vmatprep.subr.bf16.mxu0 %v3985_v23 }
  0x7f   : > { %3541 = vmatpush3.bf16.msra.mxu1 %v3540_v35 }
  0x80   : > { %2781 = vmatmul.mubr.msk.bf16.vlgmr.msra.gmra.mrb[16].mxu0 %vm281_vm1, %v4185_v6  ;;  %3542 = vmatprep.subr.bf16.mxu1 %v3985_v23  ;;  %v3366_v6 = vpack.c.bf16 %v846_v4, %v845_v3 }
  0x81   : > { %2816 = vmatprep.mubr.msk.f32.mxu0 %vm3983_vm0, %v3982_v0  ;;  %3346 = vmatpush3.bf16.msra.mxu0 %v3345_v26 }
  0x82   : > { %3347 = vmatprep.subr.bf16.mxu0 %v3985_v23 }
  0x83   : > { %3544 = vmatpush3.bf16.msra.mxu1 %v3543_v41 }
  0x84   : > { %3545 = vmatprep.subr.bf16.mxu1 %v3985_v23 }
  0x85   : > { %3349 = vmatpush3.bf16.msra.mxu0 %v3348_v32 }
  0x86   : > { %3350 = vmatprep.subr.bf16.mxu0 %v3985_v23 }
  0x87   : > { %3547 = vmatpush3.bf16.msra.mxu1 %v3546_v47 }
  0x88   : > { %3548 = vmatprep.subr.bf16.mxu1 %v3985_v23 }
  0x89   : > { %3352 = vmatpush3.bf16.msra.mxu0 %v3351_v38 }
  0x8a   : > { %3353 = vmatprep.subr.bf16.mxu0 %v3985_v23 }
  0x8b   : > { %3550 = vmatpush3.bf16.msra.mxu1 %v3549_v53 }
  0x8c   : > { %3551 = vmatprep.subr.bf16.mxu1 %v3985_v23 }
  0x8d   : > { %3355 = vmatpush3.bf16.msra.mxu0 %v3354_v44 }
  0x8e   : > { %3356 = vmatprep.subr.bf16.mxu0 %v3985_v23 }
  0x8f   : > { %3553 = vmatpush3.bf16.msra.mxu1 %v3552_v59  ;;  %v823_v59 = vand.u32 127, %v822_v55 }
  0x90   : > { %3554 = vmatprep.subr.bf16.mxu1 %v3985_v23 }
  0x91   : > { %3358 = vmatpush3.bf16.msra.mxu0 %v3357_v50  ;;  %vm824_vm2 = vcmp.lt.s32.totalorder %v823_v59, 100  ;;  %v1009_v59 = vld [vmem:[#allocation6 + $0x100] sm:$0xff] }
  0x92   : > { %3359 = vmatprep.subr.bf16.mxu0 %v3985_v23 }
  0x93   : > { %3556 = vmatpush3.bf16.msra.mxu1 %v3555_v2 }
  0x94   : > { %3557 = vmatprep.subr.bf16.mxu1 %v3985_v23 }
  0x95   : > { %3361 = vmatpush3.bf16.msra.mxu0 %v3360_v56 }
  0x96   : > { %3362 = vmatprep.subr.bf16.mxu0 %v3985_v23 }
  0x97   : > { %3559 = vmatpush3.bf16.msra.mxu1 %v3558_v8 }
  0x98   : > { %3560 = vmatprep.subr.bf16.mxu1 %v3985_v23 }
  0x99   : > { %3364 = vmatpush3.bf16.msra.mxu0 %v3363_v62 }
  0x9a   : > { %3365 = vmatprep.subr.bf16.mxu0 %v3985_v23 }
  0x9d   : > { %3367 = vmatpush3.bf16.msra.mxu0 %v3366_v6 }
  0x9e   : > { %3368 = vmatprep.subr.bf16.mxu0 %v3985_v23 }
  0xda   : > { %v811_v57 = vpop.permute.xlu0 %810 }
  0xde   : > { %v816_v3 = vpop.permute.xlu0 %815 }
 0x133   : > { %v319_v9 = vpop.f32.mrb[0].mxu0 }
 0x134   : > { %v377_v10 = vpop.f32.mrb[0].mxu1  ;;  %v2718_v11 = vpop.f32.mrb[1].mxu0 }
 0x135   : > { %v384_v12 = vmax.f32 %v319_v9, %v377_v10  ;;  %v2726_v13 = vpop.f32.mrb[1].mxu1  ;;  %v322_v14 = vpop.f32.mrb[2].mxu0  ;;  %v920_v9 = vld [vmem:[#allocation6 + $0x80] sm:$0xff]  ;;  %v921_v10 = vld [vmem:[#allocation6 + $0x88] sm:$0xff] }
 0x136   : > { %v380_v15 = vpop.f32.mrb[2].mxu1  ;;  %v2719_v16 = vpop.f32.mrb[3].mxu0  ;;  %v1632_v11 = vld [vmem:[#allocation6 + $0x480] sm:$0xff]  ;;  %v3369_v13 = vpack.c.bf16 %v921_v10, %v920_v9 }
 0x137   : > { %v385_v17 = vmax.f32 %v322_v14, %v380_v15  ;;  %v2727_v18 = vpop.f32.mrb[3].mxu1  ;;  %v922_v14 = vld [vmem:[#allocation6 + $0x90] sm:$0xff]  ;;  %v923_v15 = vld [vmem:[#allocation6 + $0x98] sm:$0xff]  ;;  %v1013_v10 = vld [vmem:[#allocation6 + $0x120] sm:$0xff] }
 0x138   : > { %v1634_v18 = vld [vmem:[#allocation6 + $0x490] sm:$0xff] }
 0x13b   : > { %v437_v19 = vpop.f32.mrb[4].mxu0 }
 0x13c   : > { %v444_v20 = vmax.f32 %v384_v12, %v437_v19  ;;  %v2734_v21 = vpop.f32.mrb[5].mxu0  ;;  %v497_v22 = vpop.f32.mrb[4].mxu1  ;;  %v1633_v12 = vld [vmem:[#allocation6 + $0x488] sm:$0xff]  ;;  %v1635_v19 = vld [vmem:[#allocation6 + $0x498] sm:$0xff] }
 0x13d   : > { %v440_v24 = vpop.f32.mrb[6].mxu0  ;;  %v2742_v25 = vpop.f32.mrb[5].mxu1  ;;  %v3372_v21 = vpack.c.bf16 %v923_v15, %v922_v14  ;;  %v1726_v14 = vld [vmem:[#allocation6 + $0x528] sm:$0xff] }
 0x13e   : > { %v445_v26 = vmax.f32 %v385_v17, %v440_v24  ;;  %v504_v27 = vmax.f32 %v444_v20, %v497_v22  ;;  %v2735_v28 = vpop.f32.mrb[7].mxu0  ;;  %v500_v29 = vpop.f32.mrb[6].mxu1  ;;  %v3561_v17 = vpack.c.bf16 %v1633_v12, %v1632_v11  ;;  %v924_v22 = vld [vmem:[#allocation6 + $0xa0] sm:$0xff]  ;;  %v925_v24 = vld [vmem:[#allocation6 + $0xa8] sm:$0xff]  ;;  %v3564_v25 = vpack.c.bf16 %v1635_v19, %v1634_v18  ;;  %v1727_v19 = vld [vmem:[#allocation6 + $0x530] sm:$0xff] }
 0x13f   : > { %v2743_v30 = vpop.f32.mrb[7].mxu1  ;;  %v3375_v28 = vpack.c.bf16 %v925_v24, %v924_v22  ;;  %v1014_v11 = vld [vmem:[#allocation6 + $0x128] sm:$0xff]  ;;  %v1017_v22 = vld [vmem:[#allocation6 + $0x140] sm:$0xff] }
 0x140   : > { %v505_v31 = vmax.f32 %v445_v26, %v500_v29  ;;  %v1636_v26 = vld [vmem:[#allocation6 + $0x4a0] sm:$0xff]  ;;  %v926_v29 = vld [vmem:[#allocation6 + $0xb0] sm:$0xff]  ;;  %v927_v30 = vld [vmem:[#allocation6 + $0xb8] sm:$0xff]  ;;  %v3399_v15 = vpack.c.bf16 %v1014_v11, %v1013_v10 }
 0x141   : > { %v1018_v24 = vld [vmem:[#allocation6 + $0x148] sm:$0xff]  ;;  %v1106_v10 = vld [vmem:[#allocation6 + $0x1c0] sm:$0xff] }
 0x142   : > { %v1107_v11 = vld [vmem:[#allocation6 + $0x1c8] sm:$0xff] }
 0x143   : > { %v557_v32 = vpop.f32.mrb[8].mxu0 }
 0x144   : > { %v564_v33 = vmax.f32 %v504_v27, %v557_v32  ;;  %v2750_v34 = vpop.f32.mrb[9].mxu0  ;;  %v617_v35 = vpop.f32.mrb[8].mxu1  ;;  %v1637_v27 = vld [vmem:[#allocation6 + $0x4a8] sm:$0xff]  ;;  %v1638_v32 = vld [vmem:[#allocation6 + $0x4b0] sm:$0xff] }
 0x145   : > { %v560_v36 = vpop.f32.mrb[10].mxu0  ;;  %v2758_v37 = vpop.f32.mrb[9].mxu1  ;;  %v3378_v34 = vpack.c.bf16 %v927_v30, %v926_v29  ;;  %v1019_v29 = vld [vmem:[#allocation6 + $0x150] sm:$0xff]  ;;  %v1020_v30 = vld [vmem:[#allocation6 + $0x158] sm:$0xff] }
 0x146   : > { %v565_v38 = vmax.f32 %v505_v31, %v560_v36  ;;  %v624_v39 = vmax.f32 %v564_v33, %v617_v35  ;;  %v2751_v40 = vpop.f32.mrb[11].mxu0  ;;  %v620_v41 = vpop.f32.mrb[10].mxu1  ;;  %v3567_v31 = vpack.c.bf16 %v1637_v27, %v1636_v26  ;;  %v1639_v33 = vld [vmem:[#allocation6 + $0x4b8] sm:$0xff]  ;;  %v928_v35 = vld [vmem:[#allocation6 + $0xc0] sm:$0xff]  ;;  %v929_v36 = vld [vmem:[#allocation6 + $0xc8] sm:$0xff] }
 0x147   : > { %v2759_v42 = vpop.f32.mrb[11].mxu1  ;;  %v3570_v37 = vpack.c.bf16 %v1639_v33, %v1638_v32  ;;  %v3381_v40 = vpack.c.bf16 %v929_v36, %v928_v35  ;;  %v1729_v26 = vld [vmem:[#allocation6 + $0x540] sm:$0xff]  ;;  %v1730_v27 = vld [vmem:[#allocation6 + $0x548] sm:$0xff]  ;;  %v1731_v32 = vld [vmem:[#allocation6 + $0x550] sm:$0xff] }
 0x148   : > { %v625_v43 = vmax.f32 %v565_v38, %v620_v41  ;;  %v1640_v38 = vld [vmem:[#allocation6 + $0x4c0] sm:$0xff]  ;;  %v930_v41 = vld [vmem:[#allocation6 + $0xd0] sm:$0xff]  ;;  %v931_v42 = vld [vmem:[#allocation6 + $0xd8] sm:$0xff] }
 0x149   : > { %v1732_v33 = vld [vmem:[#allocation6 + $0x558] sm:$0xff]  ;;  %v1021_v35 = vld [vmem:[#allocation6 + $0x160] sm:$0xff]  ;;  %v1022_v36 = vld [vmem:[#allocation6 + $0x168] sm:$0xff] }
 0x14b   : > { %v677_v44 = vpop.f32.mrb[12].mxu0 }
 0x14c   : > { %v684_v45 = vmax.f32 %v624_v39, %v677_v44  ;;  %v2766_v46 = vpop.f32.mrb[13].mxu0  ;;  %v737_v47 = vpop.f32.mrb[12].mxu1  ;;  %v1641_v39 = vld [vmem:[#allocation6 + $0x4c8] sm:$0xff]  ;;  %v1642_v44 = vld [vmem:[#allocation6 + $0x4d0] sm:$0xff] }
 0x14d   : > { %v680_v48 = vpop.f32.mrb[14].mxu0  ;;  %v2774_v49 = vpop.f32.mrb[13].mxu1  ;;  %v3384_v46 = vpack.c.bf16 %v931_v42, %v930_v41  ;;  %v1023_v41 = vld [vmem:[#allocation6 + $0x170] sm:$0xff]  ;;  %v1024_v42 = vld [vmem:[#allocation6 + $0x178] sm:$0xff] }
 0x14e   : > { %v685_v50 = vmax.f32 %v625_v43, %v680_v48  ;;  %v744_v51 = vmax.f32 %v684_v45, %v737_v47  ;;  %v2767_v52 = vpop.f32.mrb[15].mxu0  ;;  %v740_v53 = vpop.f32.mrb[14].mxu1  ;;  %v3573_v43 = vpack.c.bf16 %v1641_v39, %v1640_v38  ;;  %v1643_v45 = vld [vmem:[#allocation6 + $0x4d8] sm:$0xff]  ;;  %v932_v47 = vld [vmem:[#allocation6 + $0xe0] sm:$0xff]  ;;  %v933_v48 = vld [vmem:[#allocation6 + $0xe8] sm:$0xff] }
 0x14f   : > { %v2775_v54 = vpop.f32.mrb[15].mxu1  ;;  %v3576_v49 = vpack.c.bf16 %v1643_v45, %v1642_v44  ;;  %v3387_v52 = vpack.c.bf16 %v933_v48, %v932_v47  ;;  %v1733_v38 = vld [vmem:[#allocation6 + $0x560] sm:$0xff]  ;;  %v1734_v39 = vld [vmem:[#allocation6 + $0x568] sm:$0xff]  ;;  %v1735_v44 = vld [vmem:[#allocation6 + $0x570] sm:$0xff] }
 0x150   : > { %v745_v56 = vmax.f32 %v685_v50, %v740_v53  ;;  %v1644_v50 = vld [vmem:[#allocation6 + $0x4e0] sm:$0xff]  ;;  %v934_v53 = vld [vmem:[#allocation6 + $0xf0] sm:$0xff]  ;;  %v935_v54 = vld [vmem:[#allocation6 + $0xf8] sm:$0xff] }
 0x151   : > { %v1736_v45 = vld [vmem:[#allocation6 + $0x578] sm:$0xff]  ;;  %v1098_v47 = vld [vmem:[#allocation6 + $0x180] sm:$0xff]  ;;  %v1099_v48 = vld [vmem:[#allocation6 + $0x188] sm:$0xff] }
 0x153   : > { %v797_v58 = vpop.f32.mrb[16].mxu0 }
 0x154   : > { %v804_v60 = vmax.f32 %v744_v51, %v797_v58  ;;  %v2782_v61 = vpop.f32.mrb[17].mxu0  ;;  %v1645_v51 = vld [vmem:[#allocation6 + $0x4e8] sm:$0xff]  ;;  %v3390_v58 = vpack.c.bf16 %v935_v54, %v934_v53  ;;  %v1100_v53 = vld [vmem:[#allocation6 + $0x190] sm:$0xff]  ;;  %v1101_v54 = vld [vmem:[#allocation6 + $0x198] sm:$0xff] }
 0x155   : > { %v800_v62 = vpop.f32.mrb[18].mxu0  ;;  %v3579_v55 = vpack.c.bf16 %v1645_v51, %v1644_v50  ;;  %v1810_v50 = vld [vmem:[#allocation6 + $0x580] sm:$0xff]  ;;  %v1811_v51 = vld [vmem:[#allocation6 + $0x588] sm:$0xff] }
 0x156   : > { %v818_v63 = vadd.f32 %v811_v57, %v804_v60  ;;  %v805_v1 = vmax.f32 %v745_v56, %v800_v62  ;;  %v2783_v2 = vpop.f32.mrb[19].mxu0  ;;  %v1646_v56 = vld [vmem:[#allocation6 + $0x4f0] sm:$0xff]  ;;  %v1647_v57 = vld [vmem:[#allocation6 + $0x4f8] sm:$0xff]  ;;  %v1010_v60 = vld [vmem:[#allocation6 + $0x108] sm:$0xff] }
 0x157   : > { %v3582_v61 = vpack.c.bf16 %v1647_v57, %v1646_v56  ;;  %v1721_v62 = vld [vmem:[#allocation6 + $0x500] sm:$0xff]  ;;  %v1011_v2 = vld [vmem:[#allocation6 + $0x110] sm:$0xff]  ;;  %v3609_v56 = vpack.c.bf16 %v1811_v51, %v1810_v50  ;;  %v1192_v50 = vld [vmem:[#allocation6 + $0x228] sm:$0xff] }
 0x158   : > { %v820_v4 = vmax.f32 %v818_v63, 0.0  ;;  %v819_v5 = vadd.f32 %v816_v3, %v805_v1  ;;  %v1722_v63 = vld [vmem:[#allocation6 + $0x508] sm:$0xff]  ;;  %v3393_v1 = vpack.c.bf16 %v1010_v60, %v1009_v59  ;;  %v1012_v3 = vld [vmem:[#allocation6 + $0x118] sm:$0xff]  ;;  %v1812_v57 = vld [vmem:[#allocation6 + $0x590] sm:$0xff]  ;;  %v3420_v60 = vpack.c.bf16 %v1101_v54, %v1100_v53 }
 0x159   : > { %v3396_v9 = vpack.c.bf16 %v1012_v3, %v1011_v2  ;;  %v1815_v2 = vld [vmem:[#allocation6 + $0x5a8] sm:$0xff] }
 0x15a   : > { %v825_v6 = vsel %vm824_vm2, %v820_v4, 0.0  ;;  %v821_v7 = vmax.f32 %v819_v5, 0.0  ;;  %v3585_v5 = vpack.c.bf16 %v1722_v63, %v1721_v62  ;;  %v1103_v62 = vld [vmem:[#allocation6 + $0x1a8] sm:$0xff] }
 0x15b   : > { %827 = vst [vmem:[#allocation2] sm:$0xff] %v825_v6  ;;  %v1723_v6 = vld [vmem:[#allocation6 + $0x510] sm:$0xff]  ;;  %v1904_v53 = vld [vmem:[#allocation6 + $0x628] sm:$0xff] }
 0x15c   : > { %v826_v8 = vsel %vm824_vm2, %v821_v7, 0.0  ;;  %v1724_v7 = vld [vmem:[#allocation6 + $0x518] sm:$0xff] }
 0x15d   : > { %828 = vst [vmem:[#allocation2 + $0x8] sm:$0xff] %v826_v8  ;;  %v3588_v12 = vpack.c.bf16 %v1724_v7, %v1723_v6  ;;  %v1816_v7 = vld [vmem:[#allocation6 + $0x5b0] sm:$0xff] }
 0x162   : > { %v830_v16 = vld [vmem:[#allocation2] sm:$0x1]  ;;  %v918_v4 = vld [vmem:[#allocation2 + $0x1] sm:$0x1] }
 0x163   : > { %2817 = vmatmul.mubr.f32.vlgmr.msra.gmra.mrb[20].mxu0 %v830_v16  ;;  %v1015_v16 = vld [vmem:[#allocation6 + $0x130] sm:$0xff] }
 0x164   : > { %3370 = vmatpush3.bf16.msra.mxu0 %v3369_v13  ;;  %v1541_v20 = vld [vmem:[#allocation2 + $0x8] sm:$0x1]  ;;  %2851 = vmatprep.mubr.msk.f32.mxu0 %vm3983_vm0, %v3982_v0  ;;  %v1630_v8 = vld [vmem:[#allocation2 + $0x9] sm:$0x1]  ;;  %v1725_v13 = vld [vmem:[#allocation6 + $0x520] sm:$0xff] }
 0x165   : > { %3097 = vmatmul.mubr.f32.vlgmr.msra.gmra.mrb[16].mxu1 %v1541_v20  ;;  %3371 = vmatprep.subr.bf16.mxu0 %v3985_v23  ;;  %v3591_v18 = vpack.c.bf16 %v1726_v14, %v1725_v13  ;;  %v1728_v20 = vld [vmem:[#allocation6 + $0x538] sm:$0xff]  ;;  %v1818_v13 = vld [vmem:[#allocation6 + $0x5c0] sm:$0xff]  ;;  %v1819_v14 = vld [vmem:[#allocation6 + $0x5c8] sm:$0xff] }
 0x166   : > { %3562 = vmatpush3.bf16.msra.mxu1 %v3561_v17  ;;  %3131 = vmatprep.mubr.msk.f32.mxu1 %vm3983_vm0, %v3982_v0  ;;  %v1016_v17 = vld [vmem:[#allocation6 + $0x138] sm:$0xff] }
 0x167   : > { %3563 = vmatprep.subr.bf16.mxu1 %v3985_v23  ;;  %v1719_v59 = vld [vmem:[#allocation2 + $0xa] sm:$0x1] }
 0x168   : > { %3373 = vmatpush3.bf16.msra.mxu0 %v3372_v21  ;;  %v3402_v21 = vpack.c.bf16 %v1016_v17, %v1015_v16  ;;  %v1108_v16 = vld [vmem:[#allocation6 + $0x1d0] sm:$0xff]  ;;  %v1109_v17 = vld [vmem:[#allocation6 + $0x1d8] sm:$0xff] }
 0x169   : > { %3374 = vmatprep.subr.bf16.mxu0 %v3985_v23 }
 0x16a   : > { %3565 = vmatpush3.bf16.msra.mxu1 %v3564_v25  ;;  %v3594_v25 = vpack.c.bf16 %v1728_v20, %v1727_v19  ;;  %v1820_v19 = vld [vmem:[#allocation6 + $0x5d0] sm:$0xff]  ;;  %v1821_v20 = vld [vmem:[#allocation6 + $0x5d8] sm:$0xff] }
 0x16b   : > { %3566 = vmatprep.subr.bf16.mxu1 %v3985_v23 }
 0x16c   : > { %3376 = vmatpush3.bf16.msra.mxu0 %v3375_v28  ;;  %v3405_v28 = vpack.c.bf16 %v1018_v24, %v1017_v22  ;;  %v1110_v22 = vld [vmem:[#allocation6 + $0x1e0] sm:$0xff]  ;;  %v1111_v24 = vld [vmem:[#allocation6 + $0x1e8] sm:$0xff] }
 0x16d   : > { %3377 = vmatprep.subr.bf16.mxu0 %v3985_v23 }
 0x16e   : > { %3568 = vmatpush3.bf16.msra.mxu1 %v3567_v31  ;;  %v3597_v31 = vpack.c.bf16 %v1730_v27, %v1729_v26  ;;  %v1822_v26 = vld [vmem:[#allocation6 + $0x5e0] sm:$0xff]  ;;  %v1823_v27 = vld [vmem:[#allocation6 + $0x5e8] sm:$0xff] }
 0x16f   : > { %3569 = vmatprep.subr.bf16.mxu1 %v3985_v23 }
 0x170   : > { %3379 = vmatpush3.bf16.msra.mxu0 %v3378_v34  ;;  %v3408_v34 = vpack.c.bf16 %v1020_v30, %v1019_v29  ;;  %v1112_v29 = vld [vmem:[#allocation6 + $0x1f0] sm:$0xff]  ;;  %v1113_v30 = vld [vmem:[#allocation6 + $0x1f8] sm:$0xff] }
 0x171   : > { %3380 = vmatprep.subr.bf16.mxu0 %v3985_v23 }
 0x172   : > { %3571 = vmatpush3.bf16.msra.mxu1 %v3570_v37  ;;  %v3600_v37 = vpack.c.bf16 %v1732_v33, %v1731_v32  ;;  %v1824_v32 = vld [vmem:[#allocation6 + $0x5f0] sm:$0xff]  ;;  %v1825_v33 = vld [vmem:[#allocation6 + $0x5f8] sm:$0xff] }
 0x173   : > { %3572 = vmatprep.subr.bf16.mxu1 %v3985_v23 }
 0x174   : > { %3382 = vmatpush3.bf16.msra.mxu0 %v3381_v40  ;;  %v3411_v40 = vpack.c.bf16 %v1022_v36, %v1021_v35  ;;  %v1187_v35 = vld [vmem:[#allocation6 + $0x200] sm:$0xff]  ;;  %v1188_v36 = vld [vmem:[#allocation6 + $0x208] sm:$0xff] }
 0x175   : > { %3383 = vmatprep.subr.bf16.mxu0 %v3985_v23 }
 0x176   : > { %3574 = vmatpush3.bf16.msra.mxu1 %v3573_v43  ;;  %v3603_v43 = vpack.c.bf16 %v1734_v39, %v1733_v38  ;;  %v1899_v38 = vld [vmem:[#allocation6 + $0x600] sm:$0xff]  ;;  %v1900_v39 = vld [vmem:[#allocation6 + $0x608] sm:$0xff] }
 0x177   : > { %3575 = vmatprep.subr.bf16.mxu1 %v3985_v23 }
 0x178   : > { %3385 = vmatpush3.bf16.msra.mxu0 %v3384_v46  ;;  %v3414_v46 = vpack.c.bf16 %v1024_v42, %v1023_v41  ;;  %v1189_v41 = vld [vmem:[#allocation6 + $0x210] sm:$0xff]  ;;  %v1190_v42 = vld [vmem:[#allocation6 + $0x218] sm:$0xff] }
 0x179   : > { %3386 = vmatprep.subr.bf16.mxu0 %v3985_v23 }
 0x17a   : > { %3577 = vmatpush3.bf16.msra.mxu1 %v3576_v49  ;;  %v3606_v49 = vpack.c.bf16 %v1736_v45, %v1735_v44  ;;  %v3633_v44 = vpack.c.bf16 %v1900_v39, %v1899_v38  ;;  %v1901_v45 = vld [vmem:[#allocation6 + $0x610] sm:$0xff]  ;;  %v1281_v38 = vld [vmem:[#allocation6 + $0x2a8] sm:$0xff] }
 0x17b   : > { %3578 = vmatprep.subr.bf16.mxu1 %v3985_v23 }
 0x17c   : > { %3388 = vmatpush3.bf16.msra.mxu0 %v3387_v52  ;;  %v3417_v52 = vpack.c.bf16 %v1099_v48, %v1098_v47  ;;  %v1808_v47 = vld [vmem:[#allocation2 + $0xb] sm:$0x1]  ;;  %v3444_v48 = vpack.c.bf16 %v1190_v42, %v1189_v41  ;;  %v1993_v41 = vld [vmem:[#allocation6 + $0x6a8] sm:$0xff] }
 0x17d   : > { %3389 = vmatprep.subr.bf16.mxu0 %v3985_v23 }
 0x17e   : > { %3580 = vmatpush3.bf16.msra.mxu1 %v3579_v55  ;;  %v1007_v55 = vld [vmem:[#allocation2 + $0x2] sm:$0x1] }
 0x17f   : > { %3581 = vmatprep.subr.bf16.mxu1 %v3985_v23 }
 0x180   : > { %3391 = vmatpush3.bf16.msra.mxu0 %v3390_v58  ;;  %v1813_v58 = vld [vmem:[#allocation6 + $0x598] sm:$0xff] }
 0x181   : > { %3392 = vmatprep.subr.bf16.mxu0 %v3985_v23  ;;  %v3612_v63 = vpack.c.bf16 %v1813_v58, %v1812_v57  ;;  %v1905_v58 = vld [vmem:[#allocation6 + $0x630] sm:$0xff] }
 0x182   : > { %3583 = vmatpush3.bf16.msra.mxu1 %v3582_v61  ;;  %v1102_v61 = vld [vmem:[#allocation6 + $0x1a0] sm:$0xff] }
 0x183   : > { %2852 = vmatmul.mubr.f32.vlgmr.msra.gmra.mrb[20].mxu0 %v918_v4  ;;  %3584 = vmatprep.subr.bf16.mxu1 %v3985_v23  ;;  %v3423_v3 = vpack.c.bf16 %v1103_v62, %v1102_v61  ;;  %v1104_v4 = vld [vmem:[#allocation6 + $0x1b0] sm:$0xff]  ;;  %v1195_v61 = vld [vmem:[#allocation6 + $0x240] sm:$0xff]  ;;  %v1196_v62 = vld [vmem:[#allocation6 + $0x248] sm:$0xff] }
 0x184   : > { %3394 = vmatpush3.bf16.msra.mxu0 %v3393_v1  ;;  %2886 = vmatprep.mubr.msk.f32.mxu0 %vm3983_vm0, %v3982_v0  ;;  %v1814_v1 = vld [vmem:[#allocation6 + $0x5a0] sm:$0xff] }
 0x185   : > { %3132 = vmatmul.mubr.f32.vlgmr.msra.gmra.mrb[16].mxu1 %v1630_v8  ;;  %3395 = vmatprep.subr.bf16.mxu0 %v3985_v23  ;;  %v3615_v6 = vpack.c.bf16 %v1815_v2, %v1814_v1  ;;  %v1817_v8 = vld [vmem:[#allocation6 + $0x5b8] sm:$0xff]  ;;  %v1907_v1 = vld [vmem:[#allocation6 + $0x640] sm:$0xff]  ;;  %v1908_v2 = vld [vmem:[#allocation6 + $0x648] sm:$0xff] }
 0x186   : > { %3586 = vmatpush3.bf16.msra.mxu1 %v3585_v5  ;;  %3166 = vmatprep.mubr.msk.f32.mxu1 %vm3983_vm0, %v3982_v0  ;;  %v1105_v5 = vld [vmem:[#allocation6 + $0x1b8] sm:$0xff] }
 0x187   : > { %3587 = vmatprep.subr.bf16.mxu1 %v3985_v23 }
 0x188   : > { %3397 = vmatpush3.bf16.msra.mxu0 %v3396_v9  ;;  %v3426_v9 = vpack.c.bf16 %v1105_v5, %v1104_v4  ;;  %v1197_v4 = vld [vmem:[#allocation6 + $0x250] sm:$0xff]  ;;  %v1198_v5 = vld [vmem:[#allocation6 + $0x258] sm:$0xff] }
 0x189   : > { %3398 = vmatprep.subr.bf16.mxu0 %v3985_v23 }
 0x18a   : > { %3589 = vmatpush3.bf16.msra.mxu1 %v3588_v12  ;;  %v3618_v12 = vpack.c.bf16 %v1817_v8, %v1816_v7  ;;  %v1909_v7 = vld [vmem:[#allocation6 + $0x650] sm:$0xff]  ;;  %v1910_v8 = vld [vmem:[#allocation6 + $0x658] sm:$0xff] }
 0x18b   : > { %3590 = vmatprep.subr.bf16.mxu1 %v3985_v23 }
 0x18c   : > { %3400 = vmatpush3.bf16.msra.mxu0 %v3399_v15  ;;  %v3429_v15 = vpack.c.bf16 %v1107_v11, %v1106_v10  ;;  %v1199_v10 = vld [vmem:[#allocation6 + $0x260] sm:$0xff]  ;;  %v1200_v11 = vld [vmem:[#allocation6 + $0x268] sm:$0xff] }
 0x18d   : > { %3401 = vmatprep.subr.bf16.mxu0 %v3985_v23 }
 0x18e   : > { %3592 = vmatpush3.bf16.msra.mxu1 %v3591_v18  ;;  %v3621_v18 = vpack.c.bf16 %v1819_v14, %v1818_v13  ;;  %v1911_v13 = vld [vmem:[#allocation6 + $0x660] sm:$0xff]  ;;  %v1912_v14 = vld [vmem:[#allocation6 + $0x668] sm:$0xff] }
 0x18f   : > { %3593 = vmatprep.subr.bf16.mxu1 %v3985_v23 }
 0x190   : > { %3403 = vmatpush3.bf16.msra.mxu0 %v3402_v21  ;;  %v3432_v21 = vpack.c.bf16 %v1109_v17, %v1108_v16  ;;  %v1201_v16 = vld [vmem:[#allocation6 + $0x270] sm:$0xff]  ;;  %v1202_v17 = vld [vmem:[#allocation6 + $0x278] sm:$0xff] }
 0x191   : > { %3404 = vmatprep.subr.bf16.mxu0 %v3985_v23 }
 0x192   : > { %3595 = vmatpush3.bf16.msra.mxu1 %v3594_v25  ;;  %v3624_v25 = vpack.c.bf16 %v1821_v20, %v1820_v19  ;;  %v1913_v19 = vld [vmem:[#allocation6 + $0x670] sm:$0xff]  ;;  %v1914_v20 = vld [vmem:[#allocation6 + $0x678] sm:$0xff] }
 0x193   : > { %3596 = vmatprep.subr.bf16.mxu1 %v3985_v23 }
 0x194   : > { %3406 = vmatpush3.bf16.msra.mxu0 %v3405_v28  ;;  %v3435_v28 = vpack.c.bf16 %v1111_v24, %v1110_v22  ;;  %v1276_v22 = vld [vmem:[#allocation6 + $0x280] sm:$0xff]  ;;  %v1277_v24 = vld [vmem:[#allocation6 + $0x288] sm:$0xff] }
 0x195   : > { %3407 = vmatprep.subr.bf16.mxu0 %v3985_v23 }
 0x196   : > { %3598 = vmatpush3.bf16.msra.mxu1 %v3597_v31  ;;  %v3627_v31 = vpack.c.bf16 %v1823_v27, %v1822_v26  ;;  %v1988_v26 = vld [vmem:[#allocation6 + $0x680] sm:$0xff]  ;;  %v1989_v27 = vld [vmem:[#allocation6 + $0x688] sm:$0xff] }
 0x197   : > { %3599 = vmatprep.subr.bf16.mxu1 %v3985_v23 }
 0x198   : > { %3409 = vmatpush3.bf16.msra.mxu0 %v3408_v34  ;;  %v3438_v34 = vpack.c.bf16 %v1113_v30, %v1112_v29  ;;  %v1278_v29 = vld [vmem:[#allocation6 + $0x290] sm:$0xff]  ;;  %v1279_v30 = vld [vmem:[#allocation6 + $0x298] sm:$0xff] }
 0x199   : > { %3410 = vmatprep.subr.bf16.mxu0 %v3985_v23 }
 0x19a   : > { %3601 = vmatpush3.bf16.msra.mxu1 %v3600_v37  ;;  %v3630_v37 = vpack.c.bf16 %v1825_v33, %v1824_v32  ;;  %v3657_v32 = vpack.c.bf16 %v1989_v27, %v1988_v26  ;;  %v1990_v33 = vld [vmem:[#allocation6 + $0x690] sm:$0xff]  ;;  %v1370_v26 = vld [vmem:[#allocation6 + $0x328] sm:$0xff] }
 0x19b   : > { %3602 = vmatprep.subr.bf16.mxu1 %v3985_v23 }
 0x19c   : > { %3412 = vmatpush3.bf16.msra.mxu0 %v3411_v40  ;;  %v3441_v40 = vpack.c.bf16 %v1188_v36, %v1187_v35  ;;  %v1897_v35 = vld [vmem:[#allocation2 + $0xc] sm:$0x1]  ;;  %v3468_v36 = vpack.c.bf16 %v1279_v30, %v1278_v29  ;;  %v2082_v29 = vld [vmem:[#allocation6 + $0x728] sm:$0xff] }
 0x19d   : > { %3413 = vmatprep.subr.bf16.mxu0 %v3985_v23 }
 0x19e   : > { %3604 = vmatpush3.bf16.msra.mxu1 %v3603_v43  ;;  %v1096_v43 = vld [vmem:[#allocation2 + $0x3] sm:$0x1] }
 0x19f   : > { %3605 = vmatprep.subr.bf16.mxu1 %v3985_v23 }
 0x1a0   : > { %3415 = vmatpush3.bf16.msra.mxu0 %v3414_v46  ;;  %v1902_v46 = vld [vmem:[#allocation6 + $0x618] sm:$0xff] }
 0x1a1   : > { %3416 = vmatprep.subr.bf16.mxu0 %v3985_v23  ;;  %v3636_v51 = vpack.c.bf16 %v1902_v46, %v1901_v45  ;;  %v1994_v46 = vld [vmem:[#allocation6 + $0x6b0] sm:$0xff] }
 0x1a2   : > { %3607 = vmatpush3.bf16.msra.mxu1 %v3606_v49  ;;  %v1191_v49 = vld [vmem:[#allocation6 + $0x220] sm:$0xff] }
 0x1a3   : > { %2887 = vmatmul.mubr.f32.vlgmr.msra.gmra.mrb[20].mxu0 %v1007_v55  ;;  %3608 = vmatprep.subr.bf16.mxu1 %v3985_v23  ;;  %v3447_v54 = vpack.c.bf16 %v1192_v50, %v1191_v49  ;;  %v1193_v55 = vld [vmem:[#allocation6 + $0x230] sm:$0xff]  ;;  %v1284_v49 = vld [vmem:[#allocation6 + $0x2c0] sm:$0xff]  ;;  %v1285_v50 = vld [vmem:[#allocation6 + $0x2c8] sm:$0xff] }
 0x1a4   : > { %3418 = vmatpush3.bf16.msra.mxu0 %v3417_v52  ;;  %2921 = vmatprep.mubr.msk.f32.mxu0 %vm3983_vm0, %v3982_v0  ;;  %v1903_v52 = vld [vmem:[#allocation6 + $0x620] sm:$0xff] }
 0x1a5   : > { %3167 = vmatmul.mubr.f32.vlgmr.msra.gmra.mrb[16].mxu1 %v1719_v59  ;;  %3419 = vmatprep.subr.bf16.mxu0 %v3985_v23  ;;  %v3639_v57 = vpack.c.bf16 %v1904_v53, %v1903_v52  ;;  %v1906_v59 = vld [vmem:[#allocation6 + $0x638] sm:$0xff]  ;;  %v1996_v52 = vld [vmem:[#allocation6 + $0x6c0] sm:$0xff]  ;;  %v1997_v53 = vld [vmem:[#allocation6 + $0x6c8] sm:$0xff] }
 0x1a6   : > { %3610 = vmatpush3.bf16.msra.mxu1 %v3609_v56  ;;  %3201 = vmatprep.mubr.msk.f32.mxu1 %vm3983_vm0, %v3982_v0  ;;  %v1194_v56 = vld [vmem:[#allocation6 + $0x238] sm:$0xff] }
 0x1a7   : > { %3611 = vmatprep.subr.bf16.mxu1 %v3985_v23 }
 0x1a8   : > { %3421 = vmatpush3.bf16.msra.mxu0 %v3420_v60  ;;  %v3450_v60 = vpack.c.bf16 %v1194_v56, %v1193_v55  ;;  %v1286_v55 = vld [vmem:[#allocation6 + $0x2d0] sm:$0xff]  ;;  %v1287_v56 = vld [vmem:[#allocation6 + $0x2d8] sm:$0xff] }
 0x1a9   : > { %3422 = vmatprep.subr.bf16.mxu0 %v3985_v23 }
 0x1aa   : > { %3613 = vmatpush3.bf16.msra.mxu1 %v3612_v63  ;;  %v3642_v63 = vpack.c.bf16 %v1906_v59, %v1905_v58  ;;  %v1998_v58 = vld [vmem:[#allocation6 + $0x6d0] sm:$0xff]  ;;  %v1999_v59 = vld [vmem:[#allocation6 + $0x6d8] sm:$0xff] }
 0x1ab   : > { %3614 = vmatprep.subr.bf16.mxu1 %v3985_v23 }
 0x1ac   : > { %3424 = vmatpush3.bf16.msra.mxu0 %v3423_v3  ;;  %v3453_v3 = vpack.c.bf16 %v1196_v62, %v1195_v61  ;;  %v1288_v61 = vld [vmem:[#allocation6 + $0x2e0] sm:$0xff]  ;;  %v1289_v62 = vld [vmem:[#allocation6 + $0x2e8] sm:$0xff] }
 0x1ad   : > { %3425 = vmatprep.subr.bf16.mxu0 %v3985_v23 }
 0x1ae   : > { %3616 = vmatpush3.bf16.msra.mxu1 %v3615_v6  ;;  %v3645_v6 = vpack.c.bf16 %v1908_v2, %v1907_v1  ;;  %v2000_v1 = vld [vmem:[#allocation6 + $0x6e0] sm:$0xff]  ;;  %v2001_v2 = vld [vmem:[#allocation6 + $0x6e8] sm:$0xff] }
 0x1af   : > { %3617 = vmatprep.subr.bf16.mxu1 %v3985_v23 }
 0x1b0   : > { %3427 = vmatpush3.bf16.msra.mxu0 %v3426_v9  ;;  %v3456_v9 = vpack.c.bf16 %v1198_v5, %v1197_v4  ;;  %v1290_v4 = vld [vmem:[#allocation6 + $0x2f0] sm:$0xff]  ;;  %v1291_v5 = vld [vmem:[#allocation6 + $0x2f8] sm:$0xff] }
 0x1b1   : > { %3428 = vmatprep.subr.bf16.mxu0 %v3985_v23 }
 0x1b2   : > { %3619 = vmatpush3.bf16.msra.mxu1 %v3618_v12  ;;  %v3648_v12 = vpack.c.bf16 %v1910_v8, %v1909_v7  ;;  %v2002_v7 = vld [vmem:[#allocation6 + $0x6f0] sm:$0xff]  ;;  %v2003_v8 = vld [vmem:[#allocation6 + $0x6f8] sm:$0xff] }
 0x1b3   : > { %3620 = vmatprep.subr.bf16.mxu1 %v3985_v23 }
 0x1b4   : > { %3430 = vmatpush3.bf16.msra.mxu0 %v3429_v15  ;;  %v3459_v15 = vpack.c.bf16 %v1200_v11, %v1199_v10  ;;  %v1365_v10 = vld [vmem:[#allocation6 + $0x300] sm:$0xff]  ;;  %v1366_v11 = vld [vmem:[#allocation6 + $0x308] sm:$0xff] }
 0x1b5   : > { %3431 = vmatprep.subr.bf16.mxu0 %v3985_v23 }
 0x1b6   : > { %3622 = vmatpush3.bf16.msra.mxu1 %v3621_v18  ;;  %v3651_v18 = vpack.c.bf16 %v1912_v14, %v1911_v13  ;;  %v2077_v13 = vld [vmem:[#allocation6 + $0x700] sm:$0xff]  ;;  %v2078_v14 = vld [vmem:[#allocation6 + $0x708] sm:$0xff] }
 0x1b7   : > { %3623 = vmatprep.subr.bf16.mxu1 %v3985_v23 }
 0x1b8   : > { %3433 = vmatpush3.bf16.msra.mxu0 %v3432_v21  ;;  %v3462_v21 = vpack.c.bf16 %v1202_v17, %v1201_v16  ;;  %v1367_v16 = vld [vmem:[#allocation6 + $0x310] sm:$0xff]  ;;  %v1368_v17 = vld [vmem:[#allocation6 + $0x318] sm:$0xff] }
 0x1b9   : > { %3434 = vmatprep.subr.bf16.mxu0 %v3985_v23 }
 0x1ba   : > { %3625 = vmatpush3.bf16.msra.mxu1 %v3624_v25  ;;  %v3654_v25 = vpack.c.bf16 %v1914_v20, %v1913_v19  ;;  %v3681_v19 = vpack.c.bf16 %v2078_v14, %v2077_v13  ;;  %v2079_v20 = vld [vmem:[#allocation6 + $0x710] sm:$0xff]  ;;  %v1459_v13 = vld [vmem:[#allocation6 + $0x3a8] sm:$0xff] }
 0x1bb   : > { %3626 = vmatprep.subr.bf16.mxu1 %v3985_v23 }
 0x1bc   : > { %3436 = vmatpush3.bf16.msra.mxu0 %v3435_v28  ;;  %v3465_v28 = vpack.c.bf16 %v1277_v24, %v1276_v22  ;;  %v1986_v22 = vld [vmem:[#allocation2 + $0xd] sm:$0x1]  ;;  %v3492_v24 = vpack.c.bf16 %v1368_v17, %v1367_v16  ;;  %v2171_v16 = vld [vmem:[#allocation6 + $0x7a8] sm:$0xff] }
 0x1bd   : > { %3437 = vmatprep.subr.bf16.mxu0 %v3985_v23 }
 0x1be   : > { %3628 = vmatpush3.bf16.msra.mxu1 %v3627_v31  ;;  %v1185_v31 = vld [vmem:[#allocation2 + $0x4] sm:$0x1] }
 0x1bf   : > { %3629 = vmatprep.subr.bf16.mxu1 %v3985_v23 }
 0x1c0   : > { %3439 = vmatpush3.bf16.msra.mxu0 %v3438_v34  ;;  %v1991_v34 = vld [vmem:[#allocation6 + $0x698] sm:$0xff] }
 0x1c1   : > { %3440 = vmatprep.subr.bf16.mxu0 %v3985_v23  ;;  %v3660_v39 = vpack.c.bf16 %v1991_v34, %v1990_v33  ;;  %v2083_v34 = vld [vmem:[#allocation6 + $0x730] sm:$0xff] }
 0x1c2   : > { %3631 = vmatpush3.bf16.msra.mxu1 %v3630_v37  ;;  %v1280_v37 = vld [vmem:[#allocation6 + $0x2a0] sm:$0xff] }
 0x1c3   : > { %2922 = vmatmul.mubr.f32.vlgmr.msra.gmra.mrb[20].mxu0 %v1096_v43  ;;  %3632 = vmatprep.subr.bf16.mxu1 %v3985_v23  ;;  %v3471_v42 = vpack.c.bf16 %v1281_v38, %v1280_v37  ;;  %v1282_v43 = vld [vmem:[#allocation6 + $0x2b0] sm:$0xff]  ;;  %v1373_v37 = vld [vmem:[#allocation6 + $0x340] sm:$0xff]  ;;  %v1374_v38 = vld [vmem:[#allocation6 + $0x348] sm:$0xff] }
 0x1c4   : > { %3442 = vmatpush3.bf16.msra.mxu0 %v3441_v40  ;;  %2956 = vmatprep.mubr.msk.f32.mxu0 %vm3983_vm0, %v3982_v0  ;;  %v1992_v40 = vld [vmem:[#allocation6 + $0x6a0] sm:$0xff] }
 0x1c5   : > { %3202 = vmatmul.mubr.f32.vlgmr.msra.gmra.mrb[16].mxu1 %v1808_v47  ;;  %3443 = vmatprep.subr.bf16.mxu0 %v3985_v23  ;;  %v3663_v45 = vpack.c.bf16 %v1993_v41, %v1992_v40  ;;  %v1995_v47 = vld [vmem:[#allocation6 + $0x6b8] sm:$0xff]  ;;  %v2085_v40 = vld [vmem:[#allocation6 + $0x740] sm:$0xff]  ;;  %v2086_v41 = vld [vmem:[#allocation6 + $0x748] sm:$0xff] }
 0x1c6   : > { %3634 = vmatpush3.bf16.msra.mxu1 %v3633_v44  ;;  %3236 = vmatprep.mubr.msk.f32.mxu1 %vm3983_vm0, %v3982_v0  ;;  %v1283_v44 = vld [vmem:[#allocation6 + $0x2b8] sm:$0xff] }
 0x1c7   : > { %3635 = vmatprep.subr.bf16.mxu1 %v3985_v23 }
 0x1c8   : > { %3445 = vmatpush3.bf16.msra.mxu0 %v3444_v48  ;;  %v3474_v48 = vpack.c.bf16 %v1283_v44, %v1282_v43  ;;  %v1375_v43 = vld [vmem:[#allocation6 + $0x350] sm:$0xff]  ;;  %v1376_v44 = vld [vmem:[#allocation6 + $0x358] sm:$0xff] }
 0x1c9   : > { %3446 = vmatprep.subr.bf16.mxu0 %v3985_v23 }
 0x1ca   : > { %3637 = vmatpush3.bf16.msra.mxu1 %v3636_v51  ;;  %v3666_v51 = vpack.c.bf16 %v1995_v47, %v1994_v46  ;;  %v2087_v46 = vld [vmem:[#allocation6 + $0x750] sm:$0xff]  ;;  %v2088_v47 = vld [vmem:[#allocation6 + $0x758] sm:$0xff] }
 0x1cb   : > { %3638 = vmatprep.subr.bf16.mxu1 %v3985_v23 }
 0x1cc   : > { %3448 = vmatpush3.bf16.msra.mxu0 %v3447_v54  ;;  %v3477_v54 = vpack.c.bf16 %v1285_v50, %v1284_v49  ;;  %v1377_v49 = vld [vmem:[#allocation6 + $0x360] sm:$0xff]  ;;  %v1378_v50 = vld [vmem:[#allocation6 + $0x368] sm:$0xff] }
 0x1cd   : > { %3449 = vmatprep.subr.bf16.mxu0 %v3985_v23 }
 0x1ce   : > { %3640 = vmatpush3.bf16.msra.mxu1 %v3639_v57  ;;  %v3669_v57 = vpack.c.bf16 %v1997_v53, %v1996_v52  ;;  %v2089_v52 = vld [vmem:[#allocation6 + $0x760] sm:$0xff]  ;;  %v2090_v53 = vld [vmem:[#allocation6 + $0x768] sm:$0xff] }
 0x1cf   : > { %3641 = vmatprep.subr.bf16.mxu1 %v3985_v23 }
 0x1d0   : > { %3451 = vmatpush3.bf16.msra.mxu0 %v3450_v60  ;;  %v3480_v60 = vpack.c.bf16 %v1287_v56, %v1286_v55  ;;  %v1379_v55 = vld [vmem:[#allocation6 + $0x370] sm:$0xff]  ;;  %v1380_v56 = vld [vmem:[#allocation6 + $0x378] sm:$0xff] }
 0x1d1   : > { %3452 = vmatprep.subr.bf16.mxu0 %v3985_v23 }
 0x1d2   : > { %3643 = vmatpush3.bf16.msra.mxu1 %v3642_v63  ;;  %v3672_v63 = vpack.c.bf16 %v1999_v59, %v1998_v58  ;;  %v2091_v58 = vld [vmem:[#allocation6 + $0x770] sm:$0xff]  ;;  %v2092_v59 = vld [vmem:[#allocation6 + $0x778] sm:$0xff] }
 0x1d3   : > { %3644 = vmatprep.subr.bf16.mxu1 %v3985_v23 }
 0x1d4   : > { %3454 = vmatpush3.bf16.msra.mxu0 %v3453_v3  ;;  %v3483_v3 = vpack.c.bf16 %v1289_v62, %v1288_v61  ;;  %v1454_v61 = vld [vmem:[#allocation6 + $0x380] sm:$0xff]  ;;  %v1455_v62 = vld [vmem:[#allocation6 + $0x388] sm:$0xff] }
 0x1d5   : > { %3455 = vmatprep.subr.bf16.mxu0 %v3985_v23 }
 0x1d6   : > { %3646 = vmatpush3.bf16.msra.mxu1 %v3645_v6  ;;  %v3675_v6 = vpack.c.bf16 %v2001_v2, %v2000_v1  ;;  %v2166_v1 = vld [vmem:[#allocation6 + $0x780] sm:$0xff]  ;;  %v2167_v2 = vld [vmem:[#allocation6 + $0x788] sm:$0xff] }
 0x1d7   : > { %3647 = vmatprep.subr.bf16.mxu1 %v3985_v23 }
 0x1d8   : > { %3457 = vmatpush3.bf16.msra.mxu0 %v3456_v9  ;;  %v3486_v9 = vpack.c.bf16 %v1291_v5, %v1290_v4  ;;  %v1456_v4 = vld [vmem:[#allocation6 + $0x390] sm:$0xff]  ;;  %v1457_v5 = vld [vmem:[#allocation6 + $0x398] sm:$0xff] }
 0x1d9   : > { %3458 = vmatprep.subr.bf16.mxu0 %v3985_v23 }
 0x1da   : > { %3649 = vmatpush3.bf16.msra.mxu1 %v3648_v12  ;;  %v3678_v12 = vpack.c.bf16 %v2003_v8, %v2002_v7  ;;  %v3705_v7 = vpack.c.bf16 %v2167_v2, %v2166_v1  ;;  %v2168_v8 = vld [vmem:[#allocation6 + $0x790] sm:$0xff] }
 0x1db   : > { %3650 = vmatprep.subr.bf16.mxu1 %v3985_v23 }
 0x1dc   : > { %3460 = vmatpush3.bf16.msra.mxu0 %v3459_v15  ;;  %v3489_v15 = vpack.c.bf16 %v1366_v11, %v1365_v10  ;;  %v2075_v10 = vld [vmem:[#allocation2 + $0xe] sm:$0x1]  ;;  %v3516_v11 = vpack.c.bf16 %v1457_v5, %v1456_v4 }
 0x1dd   : > { %3461 = vmatprep.subr.bf16.mxu0 %v3985_v23 }
 0x1de   : > { %3652 = vmatpush3.bf16.msra.mxu1 %v3651_v18  ;;  %v1274_v18 = vld [vmem:[#allocation2 + $0x5] sm:$0x1] }
 0x1df   : > { %3653 = vmatprep.subr.bf16.mxu1 %v3985_v23 }
 0x1e0   : > { %3463 = vmatpush3.bf16.msra.mxu0 %v3462_v21  ;;  %v2080_v21 = vld [vmem:[#allocation6 + $0x718] sm:$0xff] }
 0x1e1   : > { %3464 = vmatprep.subr.bf16.mxu0 %v3985_v23  ;;  %v3684_v27 = vpack.c.bf16 %v2080_v21, %v2079_v20  ;;  %v2172_v21 = vld [vmem:[#allocation6 + $0x7b0] sm:$0xff] }
 0x1e2   : > { %3655 = vmatpush3.bf16.msra.mxu1 %v3654_v25  ;;  %v1369_v25 = vld [vmem:[#allocation6 + $0x320] sm:$0xff] }
 0x1e3   : > { %2957 = vmatmul.mubr.f32.vlgmr.msra.gmra.mrb[20].mxu0 %v1185_v31  ;;  %3656 = vmatprep.subr.bf16.mxu1 %v3985_v23  ;;  %v3495_v30 = vpack.c.bf16 %v1370_v26, %v1369_v25  ;;  %v1371_v31 = vld [vmem:[#allocation6 + $0x330] sm:$0xff]  ;;  %v1463_v25 = vld [vmem:[#allocation6 + $0x3c8] sm:$0xff] }
 0x1e4   : > { %3466 = vmatpush3.bf16.msra.mxu0 %v3465_v28  ;;  %2991 = vmatprep.mubr.msk.f32.mxu0 %vm3983_vm0, %v3982_v0  ;;  %v2081_v28 = vld [vmem:[#allocation6 + $0x720] sm:$0xff] }
 0x1e5   : > { %3237 = vmatmul.mubr.f32.vlgmr.msra.gmra.mrb[16].mxu1 %v1897_v35  ;;  %3467 = vmatprep.subr.bf16.mxu0 %v3985_v23  ;;  %v3687_v33 = vpack.c.bf16 %v2082_v29, %v2081_v28  ;;  %v2084_v35 = vld [vmem:[#allocation6 + $0x738] sm:$0xff]  ;;  %v2175_v28 = vld [vmem:[#allocation6 + $0x7c8] sm:$0xff] }
 0x1e6   : > { %3658 = vmatpush3.bf16.msra.mxu1 %v3657_v32  ;;  %3271 = vmatprep.mubr.msk.f32.mxu1 %vm3983_vm0, %v3982_v0  ;;  %v1372_v32 = vld [vmem:[#allocation6 + $0x338] sm:$0xff] }
 0x1e7   : > { %3659 = vmatprep.subr.bf16.mxu1 %v3985_v23 }
 0x1e8   : > { %3469 = vmatpush3.bf16.msra.mxu0 %v3468_v36  ;;  %v3498_v36 = vpack.c.bf16 %v1372_v32, %v1371_v31  ;;  %v1465_v31 = vld [vmem:[#allocation6 + $0x3d8] sm:$0xff] }
 0x1e9   : > { %3470 = vmatprep.subr.bf16.mxu0 %v3985_v23 }
 0x1ea   : > { %3661 = vmatpush3.bf16.msra.mxu1 %v3660_v39  ;;  %v3690_v39 = vpack.c.bf16 %v2084_v35, %v2083_v34  ;;  %v2177_v34 = vld [vmem:[#allocation6 + $0x7d8] sm:$0xff] }
 0x1eb   : > { %3662 = vmatprep.subr.bf16.mxu1 %v3985_v23 }
 0x1ec   : > { %3472 = vmatpush3.bf16.msra.mxu0 %v3471_v42  ;;  %v3501_v42 = vpack.c.bf16 %v1374_v38, %v1373_v37  ;;  %v1467_v37 = vld [vmem:[#allocation6 + $0x3e8] sm:$0xff] }
 0x1ed   : > { %3473 = vmatprep.subr.bf16.mxu0 %v3985_v23 }
 0x1ee   : > { %3664 = vmatpush3.bf16.msra.mxu1 %v3663_v45  ;;  %v3693_v45 = vpack.c.bf16 %v2086_v41, %v2085_v40  ;;  %v2179_v40 = vld [vmem:[#allocation6 + $0x7e8] sm:$0xff] }
 0x1ef   : > { %3665 = vmatprep.subr.bf16.mxu1 %v3985_v23 }
 0x1f0   : > { %3475 = vmatpush3.bf16.msra.mxu0 %v3474_v48  ;;  %v3504_v48 = vpack.c.bf16 %v1376_v44, %v1375_v43  ;;  %v1469_v43 = vld [vmem:[#allocation6 + $0x3f8] sm:$0xff] }
 0x1f1   : > { %3476 = vmatprep.subr.bf16.mxu0 %v3985_v23 }
 0x1f2   : > { %3667 = vmatpush3.bf16.msra.mxu1 %v3666_v51  ;;  %v3696_v51 = vpack.c.bf16 %v2088_v47, %v2087_v46  ;;  %v2181_v46 = vld [vmem:[#allocation6 + $0x7f8] sm:$0xff] }
 0x1f3   : > { %3668 = vmatprep.subr.bf16.mxu1 %v3985_v23 }
 0x1f4   : > { %3478 = vmatpush3.bf16.msra.mxu0 %v3477_v54  ;;  %v3507_v54 = vpack.c.bf16 %v1378_v50, %v1377_v49  ;;  %v1452_v49 = vld [vmem:[#allocation2 + $0x7] sm:$0x1]  ;;  %v2164_v50 = vld [vmem:[#allocation2 + $0xf] sm:$0x1] }
 0x1f5   : > { %3479 = vmatprep.subr.bf16.mxu0 %v3985_v23 }
 0x1f6   : > { %3670 = vmatpush3.bf16.msra.mxu1 %v3669_v57  ;;  %v3699_v57 = vpack.c.bf16 %v2090_v53, %v2089_v52 }
 0x1f7   : > { %3671 = vmatprep.subr.bf16.mxu1 %v3985_v23 }
 0x1f8   : > { %3481 = vmatpush3.bf16.msra.mxu0 %v3480_v60  ;;  %v3510_v60 = vpack.c.bf16 %v1380_v56, %v1379_v55 }
 0x1f9   : > { %3482 = vmatprep.subr.bf16.mxu0 %v3985_v23 }
 0x1fa   : > { %3673 = vmatpush3.bf16.msra.mxu1 %v3672_v63  ;;  %v3702_v63 = vpack.c.bf16 %v2092_v59, %v2091_v58 }
 0x1fb   : > { %3674 = vmatprep.subr.bf16.mxu1 %v3985_v23 }
 0x1fc   : > { %3484 = vmatpush3.bf16.msra.mxu0 %v3483_v3  ;;  %v3513_v3 = vpack.c.bf16 %v1455_v62, %v1454_v61 }
 0x1fd   : > { %3485 = vmatprep.subr.bf16.mxu0 %v3985_v23 }
 0x1fe   : > { %3676 = vmatpush3.bf16.msra.mxu1 %v3675_v6  ;;  %v1363_v6 = vld [vmem:[#allocation2 + $0x6] sm:$0x1] }
 0x1ff   : > { %3677 = vmatprep.subr.bf16.mxu1 %v3985_v23 }
 0x200   : > { %3487 = vmatpush3.bf16.msra.mxu0 %v3486_v9  ;;  %v2169_v9 = vld [vmem:[#allocation6 + $0x798] sm:$0xff] }
 0x201   : > { %3488 = vmatprep.subr.bf16.mxu0 %v3985_v23  ;;  %v3708_v14 = vpack.c.bf16 %v2169_v9, %v2168_v8 }
 0x202   : > { %3679 = vmatpush3.bf16.msra.mxu1 %v3678_v12  ;;  %v1458_v12 = vld [vmem:[#allocation6 + $0x3a0] sm:$0xff] }
 0x203   : > { %2992 = vmatmul.mubr.f32.vlgmr.msra.gmra.mrb[20].mxu0 %v1274_v18  ;;  %3680 = vmatprep.subr.bf16.mxu1 %v3985_v23  ;;  %v3519_v17 = vpack.c.bf16 %v1459_v13, %v1458_v12  ;;  %v1460_v18 = vld [vmem:[#allocation6 + $0x3b0] sm:$0xff] }
 0x204   : > { %3490 = vmatpush3.bf16.msra.mxu0 %v3489_v15  ;;  %3026 = vmatprep.mubr.msk.f32.mxu0 %vm3983_vm0, %v3982_v0  ;;  %v2170_v15 = vld [vmem:[#allocation6 + $0x7a0] sm:$0xff] }
 0x205   : > { %3272 = vmatmul.mubr.f32.vlgmr.msra.gmra.mrb[16].mxu1 %v1986_v22  ;;  %3491 = vmatprep.subr.bf16.mxu0 %v3985_v23  ;;  %v3711_v20 = vpack.c.bf16 %v2171_v16, %v2170_v15  ;;  %v2173_v22 = vld [vmem:[#allocation6 + $0x7b8] sm:$0xff] }
 0x206   : > { %3682 = vmatpush3.bf16.msra.mxu1 %v3681_v19  ;;  %3306 = vmatprep.mubr.msk.f32.mxu1 %vm3983_vm0, %v3982_v0  ;;  %v1461_v19 = vld [vmem:[#allocation6 + $0x3b8] sm:$0xff]  ;;  %v3714_v26 = vpack.c.bf16 %v2173_v22, %v2172_v21 }
 0x207   : > { %3683 = vmatprep.subr.bf16.mxu1 %v3985_v23 }
 0x208   : > { %3493 = vmatpush3.bf16.msra.mxu0 %v3492_v24  ;;  %v3522_v24 = vpack.c.bf16 %v1461_v19, %v1460_v18 }
 0x209   : > { %3494 = vmatprep.subr.bf16.mxu0 %v3985_v23 }
 0x20a   : > { %3685 = vmatpush3.bf16.msra.mxu1 %v3684_v27  ;;  %v2174_v27 = vld [vmem:[#allocation6 + $0x7c0] sm:$0xff] }
 0x20b   : > { %3686 = vmatprep.subr.bf16.mxu1 %v3985_v23  ;;  %v3717_v32 = vpack.c.bf16 %v2175_v28, %v2174_v27 }
 0x20c   : > { %3496 = vmatpush3.bf16.msra.mxu0 %v3495_v30  ;;  %v1464_v30 = vld [vmem:[#allocation6 + $0x3d0] sm:$0xff] }
 0x20d   : > { %3497 = vmatprep.subr.bf16.mxu0 %v3985_v23  ;;  %v3528_v35 = vpack.c.bf16 %v1465_v31, %v1464_v30 }
 0x20e   : > { %3688 = vmatpush3.bf16.msra.mxu1 %v3687_v33  ;;  %v2176_v33 = vld [vmem:[#allocation6 + $0x7d0] sm:$0xff] }
 0x20f   : > { %3689 = vmatprep.subr.bf16.mxu1 %v3985_v23  ;;  %v3720_v38 = vpack.c.bf16 %v2177_v34, %v2176_v33 }
 0x210   : > { %3499 = vmatpush3.bf16.msra.mxu0 %v3498_v36  ;;  %v1466_v36 = vld [vmem:[#allocation6 + $0x3e0] sm:$0xff] }
 0x211   : > { %3500 = vmatprep.subr.bf16.mxu0 %v3985_v23  ;;  %v3531_v41 = vpack.c.bf16 %v1467_v37, %v1466_v36 }
 0x212   : > { %3691 = vmatpush3.bf16.msra.mxu1 %v3690_v39  ;;  %v2178_v39 = vld [vmem:[#allocation6 + $0x7e0] sm:$0xff] }
 0x213   : > { %3692 = vmatprep.subr.bf16.mxu1 %v3985_v23  ;;  %v3723_v44 = vpack.c.bf16 %v2179_v40, %v2178_v39 }
 0x214   : > { %3502 = vmatpush3.bf16.msra.mxu0 %v3501_v42  ;;  %v1468_v42 = vld [vmem:[#allocation6 + $0x3f0] sm:$0xff] }
 0x215   : > { %3503 = vmatprep.subr.bf16.mxu0 %v3985_v23  ;;  %v3534_v47 = vpack.c.bf16 %v1469_v43, %v1468_v42 }
 0x216   : > { %3694 = vmatpush3.bf16.msra.mxu1 %v3693_v45  ;;  %v2180_v45 = vld [vmem:[#allocation6 + $0x7f0] sm:$0xff] }
 0x217   : > { %3695 = vmatprep.subr.bf16.mxu1 %v3985_v23 }
 0x218   : > { %3505 = vmatpush3.bf16.msra.mxu0 %v3504_v48  ;;  %v3726_v48 = vpack.c.bf16 %v2181_v46, %v2180_v45 }
 0x219   : > { %3506 = vmatprep.subr.bf16.mxu0 %v3985_v23 }
 0x21a   : > { %3697 = vmatpush3.bf16.msra.mxu1 %v3696_v51  ;;  %v829_v51 = vld [vmem:[%s4469_s4] sm:$0x1] }
 0x21b   : > { %3698 = vmatprep.subr.bf16.mxu1 %v3985_v23 }
 0x21c   : > { %3508 = vmatpush3.bf16.msra.mxu0 %v3507_v54 }
 0x21d   : > { %3509 = vmatprep.subr.bf16.mxu0 %v3985_v23 }
 0x21e   : > { %3700 = vmatpush3.bf16.msra.mxu1 %v3699_v57 }
 0x21f   : > { %3701 = vmatprep.subr.bf16.mxu1 %v3985_v23 }
 0x220   : > { %3511 = vmatpush3.bf16.msra.mxu0 %v3510_v60 }
 0x221   : > { %3512 = vmatprep.subr.bf16.mxu0 %v3985_v23 }
 0x222   : > { %3703 = vmatpush3.bf16.msra.mxu1 %v3702_v63 }
 0x223   : > { %3027 = vmatmul.mubr.f32.vlgmr.msra.gmra.mrb[20].mxu0 %v1363_v6  ;;  %3704 = vmatprep.subr.bf16.mxu1 %v3985_v23 }
 0x224   : > { %3514 = vmatpush3.bf16.msra.mxu0 %v3513_v3  ;;  %3061 = vmatprep.mubr.msk.f32.mxu0 %vm3983_vm0, %v3982_v0 }
 0x225   : > { %3307 = vmatmul.mubr.f32.vlgmr.msra.gmra.mrb[16].mxu1 %v2075_v10  ;;  %3515 = vmatprep.subr.bf16.mxu0 %v3985_v23 }
 0x226   : > { %3706 = vmatpush3.bf16.msra.mxu1 %v3705_v7  ;;  %3341 = vmatprep.mubr.msk.f32.mxu1 %vm3983_vm0, %v3982_v0  ;;  %v1462_v0 = vld [vmem:[#allocation6 + $0x3c0] sm:$0xff] }
 0x227   : > { %3707 = vmatprep.subr.bf16.mxu1 %v3985_v23  ;;  %v3525_v29 = vpack.c.bf16 %v1463_v25, %v1462_v0 }
 0x228   : > { %3517 = vmatpush3.bf16.msra.mxu0 %v3516_v11 }
 0x229   : > { %3518 = vmatprep.subr.bf16.mxu0 %v3985_v23 }
 0x22a   : > { %3709 = vmatpush3.bf16.msra.mxu1 %v3708_v14 }
 0x22b   : > { %3710 = vmatprep.subr.bf16.mxu1 %v3985_v23 }
 0x22c   : > { %3520 = vmatpush3.bf16.msra.mxu0 %v3519_v17 }
 0x22d   : > { %3521 = vmatprep.subr.bf16.mxu0 %v3985_v23 }
 0x22e   : > { %3712 = vmatpush3.bf16.msra.mxu1 %v3711_v20 }
 0x22f   : > { %3713 = vmatprep.subr.bf16.mxu1 %v3985_v23 }
 0x230   : > { %3523 = vmatpush3.bf16.msra.mxu0 %v3522_v24 }
 0x231   : > { %3524 = vmatprep.subr.bf16.mxu0 %v3985_v23 }
 0x232   : > { %3715 = vmatpush3.bf16.msra.mxu1 %v3714_v26 }
 0x233   : > { %3716 = vmatprep.subr.bf16.mxu1 %v3985_v23 }
 0x234   : > { %3526 = vmatpush3.bf16.msra.mxu0 %v3525_v29 }
 0x235   : > { %3527 = vmatprep.subr.bf16.mxu0 %v3985_v23 }
 0x236   : > { %3718 = vmatpush3.bf16.msra.mxu1 %v3717_v32 }
 0x237   : > { %3719 = vmatprep.subr.bf16.mxu1 %v3985_v23 }
 0x238   : > { %3529 = vmatpush3.bf16.msra.mxu0 %v3528_v35 }
 0x239   : > { %3530 = vmatprep.subr.bf16.mxu0 %v3985_v23 }
 0x23a   : > { %3721 = vmatpush3.bf16.msra.mxu1 %v3720_v38 }
 0x23b   : > { %3722 = vmatprep.subr.bf16.mxu1 %v3985_v23 }
 0x23c   : > { %3532 = vmatpush3.bf16.msra.mxu0 %v3531_v41 }
 0x23d   : > { %3533 = vmatprep.subr.bf16.mxu0 %v3985_v23 }
 0x23e   : > { %3724 = vmatpush3.bf16.msra.mxu1 %v3723_v44 }
 0x23f   : > { %3725 = vmatprep.subr.bf16.mxu1 %v3985_v23 }
 0x240   : > { %3535 = vmatpush3.bf16.msra.mxu0 %v3534_v47 }
 0x242   : > { %3727 = vmatpush3.bf16.msra.mxu1 %v3726_v48 }
 0x243   : > { %3062 = vmatmul.mubr.f32.vlgmr.msra.gmra.mrb[20].mxu0 %v1452_v49 }
 0x245   : > { %3342 = vmatmul.mubr.f32.vlgmr.msra.gmra.mrb[16].mxu1 %v2164_v50 }
 0x316   : > { %v1536_v52 = vpop.f32.mrb[20].mxu0 }
 0x317   : > { %v3728_v53 = vadd.f32 %v1536_v52, %v829_v51  ;;  %v3063_v54 = vpop.f32.mrb[21].mxu0 }
 0x318   : > { %v2248_v55 = vpop.f32.mrb[16].mxu1 }
 0x319   : > { %v3729_v23 = vadd.f32 %v3728_v53, %v2248_v55  ;;  %v3343_v56 = vpop.f32.mrb[17].mxu1 }
 0x31b   : > { %2253 = vst [vmem:[%s256_s6] sm:$0x1] %v3729_v23 }
 0x31c   : > { %3917 = shalt.err (!%p3914_p7)
}
 0x31d   : > { %s3918_s23 = scalar_lea.hbm %s4421_s11, 16  ;;  %s3922_s15 = scalar_lea.hbm %s4470_s5, 32 }
 0x31e   : > { %p3919_p9 = scmp.ne.s32.totalorder %s4421_s11, %s3918_s23  ;;  %p3923_p5 = scmp.lt.u32.totalorder %s4421_s11, %s4470_s5 }
 0x31f   : > { %p3924_p11 = scmp.lt.u32.totalorder %s3922_s15, %s3918_s23  ;;  %p3926_p4 = scmp.lt.u32.totalorder %s3918_s23, %s4421_s11 }
 0x320   : > { %p3920_p2 = pnand %p3919_p9, %p4108_p12 }
 0x321   : > { %p3925_p1 = por %p3924_p11, %p3923_p5 }
 0x322   : > { %p3921_p0 = pneg %p3920_p2 }
 0x323   : > { %p3927_p6 = por %p3926_p4, %p3925_p1 }
 0x325   : > { %p3928_p8 = pnand %p3927_p6, %p3921_p0 }
 0x327   : > { %3931 = shalt.err (!%p3928_p8)
}
 0x328   : > { %3767 = dma.vmem_to_hbm [thread:$0]  (%p4108_p12), %s4423_s16, 16, %s4421_s11, %s2255_s29  }
 0x329 PF: > { %s2279_s13 = sand.u32 1, %s3962_s18   ;;  %p4485_p10 = scmp.ne.s32.totalorder %s4475_s25, 0 }
 0x32a   : > { %p4486_p13 = scmp.ge.s32.totalorder %s3974_s21, 2  ;;  %s2280_s6 = scalar_lea.sflag [#allocation5], %s2279_s13 }
 0x32c   : > { %p3778_p3 = pnand %p4486_p13, %p4485_p10 }
 0x32e   : > { %3957 = dma.done.wait (!%p3778_p3), %s2280_s6, 16  }
 0x32f   : > { %3959 = vsyncadd (!%p3778_p3), %s2280_s6, 4294967280  ;;  %p19_p7 = scmp.ge.s32.totalorder %s4073_s30, 4   ;;  %s4487_s18 = smov %s3966_s19 }
 0x330   : > { %s4488_s19 = smov %s3970_s20  ;;  %s4489_s20 = smov %s4104_s8 }
 0x331   : > { %s4490_s21 = smov %s4073_s30  ;;  %21 = sbr.rel (!%p19_p7) target bundleno = 6 (0x6), region = 112 }
 0x338   :  { %2284 = vsyncpa [#allocation4], 1 }
 0x339   :  { %2286 = vsyncpa [#allocation4 + $0x1], 1 }
 0x33a   :  { %2287 = vsyncpa [#allocation7], 1 }
 0x33b   :  { %2288 = vsyncpa [#allocation5], 1 }
 0x33c   :  { %2290 = vsyncpa [#allocation5 + $0x1], 1 }

</bundles_post_ra>
